<compile_context>
chip_gen: v5e
topology: v5e:2x2
jax: 0.10.0
libtpu: 0.0.40
codegen_flags: <defaults>
</compile_context>

<pallas_src>
import jax
import jax.numpy as jnp
import numpy as np
from jax import lax
from jax.experimental import pallas as pl
from jax.experimental.pallas import tpu as pltpu

_EPS = 1e-5  # PyTorch BatchNorm1d default eps


# -----------------------------------------------------------------------------
# Fused forward (one pallas_call for every head / every layer)
# -----------------------------------------------------------------------------
def _fused_forward(structure, x_ncl, *arrays):
    """structure: static tuple of (head_name, (layer_type, ...), out_channels).
    arrays: flat tuple of parameter arrays in the same order."""
    B, Cin, L = x_ncl.shape
    BL = B * L
    sum_cout = sum(c for _, _, c in structure)

    K = arrays[0].shape[0]
    # TODO(synk): even kernel_size yields output length L+1 in PyTorch Conv1d;
    # only odd K (same-length output) is supported here.
    assert K % 2 == 1, "only odd kernel_size supported"
    pad = K // 2

    # --- wrapper-side (XLA, fused under jit) weight re-layout, all tiny ------
    # Per-tap weights: w_t[k, co, ci] == torch Conv1d weight[co, ci, k].
    kernel_inputs = []
    biases = []
    it = iter(arrays)
    off = 0
    for _, layer_types, cout in structure:
        for lt in layer_types:
            if lt == 'conv_bn_relu':
                w = next(it)                       # (K, Cin_l, Ch)
                g = next(it)                       # (Ch, 1)
                b = next(it)                       # (Ch, 1)
                kernel_inputs += [jnp.transpose(w, (0, 2, 1)), g, b]
            else:                                  # final conv (with bias)
                w = next(it)                       # (K, Cin_l, cout)
                b = next(it)                       # (cout, 1)
                w_t = jnp.transpose(w, (0, 2, 1))  # (K, cout, Cin_l)
                # Zero-pad rows to the concatenated output slab so the kernel
                # accumulates every head into a single (sum_cout, B*L) store.
                w_pad = jnp.pad(
                    w_t, ((0, 0), (off, sum_cout - off - cout), (0, 0)))
                kernel_inputs.append(w_pad)
                biases.append(b)
        off += cout
    bias_all = jnp.concatenate(biases, axis=0)     # (sum_cout, 1)
    kernel_inputs.append(bias_all)

    # NCL -> channels-major (Cin, B*L), column index = b*L + l.
    x_cm = jnp.transpose(x_ncl, (1, 0, 2)).reshape(Cin, BL).astype(jnp.float32)

    shifts = tuple(k - pad for k in range(K))      # static

    def kernel(x_ref, *refs):
        out_ref = refs[-1]
        bias_ref = refs[-2]
        wrefs = refs[:-2]

        # Position of each lane (column) within its length-L sequence; the
        # validity mask for each non-zero tap shift is computed ONCE here and
        # reused by every layer of every head.
        lpos = lax.broadcasted_iota(jnp.int32, (1, BL), 1) % L
        masks = {s: jnp.logical_and(lpos + s >= 0, lpos + s < L)
                 for s in shifts if s != 0}

        def taps_of(h):
            # tap s: column j holds h[:, j+s] within its own sequence, else 0.
            # XLU lane roll + VPU select; also kills cross-batch wraparound.
            taps = []
            for s in shifts:
                if s == 0:
                    taps.append(h)
                else:
                    rolled = pltpu.roll(h, (-s) % BL, axis=1)
                    taps.append(jnp.where(masks[s], rolled, 0.0))
            return taps

        x_taps = taps_of(x_ref[...])               # shared by all heads

        acc = jnp.zeros((sum_cout, BL), jnp.float32)
        idx = 0
        for _, layer_types, _ in structure:        # static Python loops
            h_taps = x_taps
            for lt in layer_types:
                if lt == 'conv_bn_relu':
                    w = wrefs[idx]                 # (K, Ch, Cin_l)
                    g = wrefs[idx + 1][...]
                    b = wrefs[idx + 2][...]
                    idx += 3
                    ch = w.shape[1]
                    # Conv1d (no bias) = sum over taps of small MXU matmuls.
                    y = jnp.zeros((ch, BL), jnp.float32)
                    for k in range(K):
                        y = y + jnp.dot(w[k], h_taps[k],
                                        preferred_element_type=jnp.float32)
                    # BatchNorm1d, training-mode batch stats (biased variance);
                    # running-stat momentum update does not affect the output.
                    mu = jnp.mean(y, axis=1, keepdims=True)
                    var = jnp.mean(jnp.square(y - mu), axis=1, keepdims=True)
                    h = jnp.maximum(
                        (y - mu) * lax.rsqrt(var + _EPS) * g + b, 0.0)
                    h_taps = taps_of(h)
                else:  # final conv (bias), rows pre-padded to sum_cout
                    w = wrefs[idx]                 # (K, sum_cout, Ch)
                    idx += 1
                    for k in range(K):
                        acc = acc + jnp.dot(w[k], h_taps[k],
                                            preferred_element_type=jnp.float32)
        out_ref[...] = acc + bias_ref[...]         # single slab store

    vmem = pl.BlockSpec(memory_space=pltpu.MemorySpace.VMEM)
    out_flat = pl.pallas_call(
        kernel,
        out_shape=jax.ShapeDtypeStruct((sum_cout, BL), jnp.float32),
        in_specs=[vmem] * (1 + len(kernel_inputs)),
        out_specs=vmem,
    )(x_cm, *kernel_inputs)

    # channels-major slab -> NCL, single transpose, then per-head slices.
    out = jnp.transpose(out_flat.reshape(sum_cout, B, L), (1, 0, 2))
    ret = {}
    off = 0
    for name, _, cout in structure:
        ret[name] = out[:, off:off + cout, :]
        off += cout
    return ret


_fused_forward_jit = jax.jit(_fused_forward, static_argnums=(0,))


def separate_head_forward(params, x_ncl):
    """x_ncl: (B, Cin, L) exactly like the PyTorch module.
    Returns dict of (B, out_channels, L) arrays (NCL, like PyTorch)."""
    structure = tuple(
        (name,
         tuple(layer['type'] for layer in layers),
         int(layers[-1]['w'].shape[-1]))
        for name, layers in params.items())
    flat = []
    for _, layers in params.items():
        for layer in layers:
            if layer['type'] == 'conv_bn_relu':
                flat += [layer['w'], layer['gamma'], layer['beta']]
            else:
                flat += [layer['w'], layer['b']]
    return _fused_forward_jit(structure, x_ncl, *flat)


# -----------------------------------------------------------------------------
# Parameters (same shapes / init logic as the PyTorch module)
# -----------------------------------------------------------------------------
def init_separate_head_params(key, input_channels, head_channels, kernel_size,
                              sep_head_dict, init_bias=-2.19):
    """Deterministic synthetic parameters with the module's shapes.
    Conv weight stored as w[k, ci, co] == torch Conv1d weight[co, ci, k]."""
    params = {}
    for cur_name in sep_head_dict:
        out_channels = sep_head_dict[cur_name]['out_channels']
        num_conv = sep_head_dict[cur_name]['num_conv']
        layers = []
        cin = input_channels
        for _ in range(num_conv - 1):
            key, kw, kg, kb = jax.random.split(key, 4)
            layers.append({
                'type': 'conv_bn_relu',
                'w': 0.1 * jax.random.normal(
                    kw, (kernel_size, cin, head_channels), jnp.float32),
                'gamma': 1.0 + 0.1 * jax.random.normal(
                    kg, (head_channels, 1), jnp.float32),
                'beta': 0.1 * jax.random.normal(
                    kb, (head_channels, 1), jnp.float32),
            })
            cin = head_channels
        key, kw, kb = jax.random.split(key, 3)
        # Mirrors PyTorch: bias fill only when 'hm' is a substring of the head
        # name. The kaiming_normal_ branch only touches nn.Conv2d modules
        # (none exist here) -> no-op.
        if 'hm' in cur_name:
            bias = jnp.full((out_channels, 1), init_bias, jnp.float32)
        else:
            bias = 0.1 * jax.random.normal(kb, (out_channels, 1), jnp.float32)
        layers.append({
            'type': 'conv_bias',
            'w': 0.1 * jax.random.normal(
                kw, (kernel_size, cin, out_channels), jnp.float32),
            'b': bias,
        })
        params[cur_name] = layers
    return params


# -----------------------------------------------------------------------------
# Pure-JAX reference (mirrors PyTorch semantics) for correctness checking
# -----------------------------------------------------------------------------
def _reference_forward(params, x_ncl, eps=_EPS):
    ret = {}
    for name, layers in params.items():
        h = x_ncl                                   # (B, C, L)
        for layer in layers:
            w = layer['w']                          # (K, Cin, Cout)
            K = w.shape[0]
            p = K // 2
            Lc = h.shape[2]
            hp = jnp.pad(h, ((0, 0), (0, 0), (p, p)))
            cols = jnp.stack([hp[:, :, k:k + Lc] for k in range(K)], axis=0)
            y = jnp.einsum('kbcl,kco->bol', cols, w,
                           precision=lax.Precision.HIGHEST)
            if layer['type'] == 'conv_bn_relu':
                mu = jnp.mean(y, axis=(0, 2), keepdims=True)
                var = jnp.mean(jnp.square(y - mu), axis=(0, 2), keepdims=True)
                g = layer['gamma'].reshape(1, -1, 1)
                b = layer['beta'].reshape(1, -1, 1)
                y = jnp.maximum((y - mu) * lax.rsqrt(var + eps) * g + b, 0.0)
            else:
                y = y + layer['b'].reshape(1, -1, 1)
            h = y
        ret[name] = h
    return ret


# -----------------------------------------------------------------------------
if __name__ == "__main__":
    key = jax.random.PRNGKey(0)

    B = 2
    L = 16                     # number of proposals (sequence length)
    input_channels = 32
    head_channels = 32
    kernel_size = 3
    sep_head_dict = {
        'center': {'out_channels': 2, 'num_conv': 2},
        'dim':    {'out_channels': 3, 'num_conv': 2},
        'hm':     {'out_channels': 4, 'num_conv': 2},   # 'hm' -> -2.19 bias fill
    }

    key, kp, kx = jax.random.split(key, 3)
    params = init_separate_head_params(kp, input_channels, head_channels,
                                       kernel_size, sep_head_dict)
    x = jax.random.normal(kx, (B, input_channels, L), jnp.float32)

    out = separate_head_forward(params, x)
    out = jax.tree_util.tree_map(jax.block_until_ready, out)

    ref = _reference_forward(params, x)
    for name, cfg in sep_head_dict.items():
        assert out[name].shape == (B, cfg['out_channels'], L), (name, out[name].shape)
        np.testing.assert_allclose(np.asarray(out[name]), np.asarray(ref[name]),
                                   rtol=1e-2, atol=1e-2)

    print("KERNEL_OK")
</pallas_src>

<mosaic_0001>
module attributes {stable_mosaic.version = 11 : i64} {
  func.func @kernel(%arg0: memref<32x32xf32, #tpu.memory_space<vmem>>, %arg1: memref<3x32x32xf32, #tpu.memory_space<vmem>>, %arg2: memref<32x1xf32, #tpu.memory_space<vmem>>, %arg3: memref<32x1xf32, #tpu.memory_space<vmem>>, %arg4: memref<3x9x32xf32, #tpu.memory_space<vmem>>, %arg5: memref<3x32x32xf32, #tpu.memory_space<vmem>>, %arg6: memref<32x1xf32, #tpu.memory_space<vmem>>, %arg7: memref<32x1xf32, #tpu.memory_space<vmem>>, %arg8: memref<3x9x32xf32, #tpu.memory_space<vmem>>, %arg9: memref<3x32x32xf32, #tpu.memory_space<vmem>>, %arg10: memref<32x1xf32, #tpu.memory_space<vmem>>, %arg11: memref<32x1xf32, #tpu.memory_space<vmem>>, %arg12: memref<3x9x32xf32, #tpu.memory_space<vmem>>, %arg13: memref<9x1xf32, #tpu.memory_space<vmem>>, %arg14: memref<9x32xf32, #tpu.memory_space<vmem>>) attributes {dimension_semantics = [], scalar_prefetch = 0 : i64, scratch_operands = 0 : i64, tpu.core_type = #tpu.core_type<tc>} {
    %0 = tpu.iota {dimensions = array<i32: 1>} : vector<1x32xi32>
    %c16_i32 = arith.constant 16 : i32
    %c0_i32 = arith.constant 0 : i32
    %1 = arith.cmpi eq, %c16_i32, %c0_i32 : i32
    %c1_i32 = arith.constant 1 : i32
    %2 = arith.select %1, %c1_i32, %c16_i32 : i32
    %3 = vector.broadcast %2 : i32 to vector<1x32xi32>
    %4 = arith.remsi %0, %3 : vector<1x32xi32>
    %c0_i32_0 = arith.constant 0 : i32
    %5 = vector.broadcast %c0_i32_0 : i32 to vector<1x32xi32>
    %6 = arith.cmpi ne, %4, %5 : vector<1x32xi32>
    %c0_i32_1 = arith.constant 0 : i32
    %7 = vector.broadcast %c0_i32_1 : i32 to vector<1x32xi32>
    %8 = arith.cmpi slt, %4, %7 : vector<1x32xi32>
    %c0_i32_2 = arith.constant 0 : i32
    %9 = arith.cmpi slt, %2, %c0_i32_2 : i32
    %10 = vector.broadcast %9 : i1 to vector<1x32xi1>
    %11 = vector.broadcast %10 : vector<1x32xi1> to vector<1x32xi1>
    %12 = arith.xori %8, %11 : vector<1x32xi1>
    %13 = arith.andi %12, %6 : vector<1x32xi1>
    %14 = vector.broadcast %2 : i32 to vector<1x32xi32>
    %15 = arith.addi %4, %14 : vector<1x32xi32>
    %16 = arith.select %13, %15, %4 : vector<1x32xi1>, vector<1x32xi32>
    %c-1_i32 = arith.constant -1 : i32
    %17 = vector.broadcast %c-1_i32 : i32 to vector<1x32xi32>
    %18 = arith.addi %16, %17 : vector<1x32xi32>
    %c0_i32_3 = arith.constant 0 : i32
    %19 = vector.broadcast %c0_i32_3 : i32 to vector<1x32xi32>
    %20 = arith.cmpi sge, %18, %19 : vector<1x32xi32>
    %c-1_i32_4 = arith.constant -1 : i32
    %21 = vector.broadcast %c-1_i32_4 : i32 to vector<1x32xi32>
    %22 = arith.addi %16, %21 : vector<1x32xi32>
    %c16_i32_5 = arith.constant 16 : i32
    %23 = vector.broadcast %c16_i32_5 : i32 to vector<1x32xi32>
    %24 = arith.cmpi slt, %22, %23 : vector<1x32xi32>
    %25 = arith.andi %20, %24 : vector<1x32xi1>
    %c1_i32_6 = arith.constant 1 : i32
    %26 = vector.broadcast %c1_i32_6 : i32 to vector<1x32xi32>
    %27 = arith.addi %16, %26 : vector<1x32xi32>
    %c0_i32_7 = arith.constant 0 : i32
    %28 = vector.broadcast %c0_i32_7 : i32 to vector<1x32xi32>
    %29 = arith.cmpi sge, %27, %28 : vector<1x32xi32>
    %c1_i32_8 = arith.constant 1 : i32
    %30 = vector.broadcast %c1_i32_8 : i32 to vector<1x32xi32>
    %31 = arith.addi %16, %30 : vector<1x32xi32>
    %c16_i32_9 = arith.constant 16 : i32
    %32 = vector.broadcast %c16_i32_9 : i32 to vector<1x32xi32>
    %33 = arith.cmpi slt, %31, %32 : vector<1x32xi32>
    %34 = arith.andi %29, %33 : vector<1x32xi1>
    %c0 = arith.constant 0 : index
    %c0_10 = arith.constant 0 : index
    %35 = vector.load %arg0[%c0, %c0_10] : memref<32x32xf32, #tpu.memory_space<vmem>>, vector<32x32xf32>
    %c1_i32_11 = arith.constant 1 : i32
    %36 = tpu.dynamic_rotate %35 by %c1_i32_11 dim 1 : vector<32x32xf32>, i32 -> vector<32x32xf32>
    %cst = arith.constant 0.000000e+00 : f32
    %37 = vector.shape_cast %25 : vector<1x32xi1> to vector<1x32xi1>
    %38 = vector.broadcast %37 : vector<1x32xi1> to vector<32x32xi1>
    %39 = vector.broadcast %cst : f32 to vector<32x32xf32>
    %40 = arith.select %38, %36, %39 : vector<32x32xi1>, vector<32x32xf32>
    %c31_i32 = arith.constant 31 : i32
    %41 = tpu.dynamic_rotate %35 by %c31_i32 dim 1 : vector<32x32xf32>, i32 -> vector<32x32xf32>
    %cst_12 = arith.constant 0.000000e+00 : f32
    %42 = vector.shape_cast %34 : vector<1x32xi1> to vector<1x32xi1>
    %43 = vector.broadcast %42 : vector<1x32xi1> to vector<32x32xi1>
    %44 = vector.broadcast %cst_12 : f32 to vector<32x32xf32>
    %45 = arith.select %43, %41, %44 : vector<32x32xi1>, vector<32x32xf32>
    %cst_13 = arith.constant 0.000000e+00 : f32
    %46 = vector.broadcast %cst_13 : f32 to vector<9x32xf32>
    %c0_14 = arith.constant 0 : index
    %c0_15 = arith.constant 0 : index
    %47 = vector.load %arg2[%c0_14, %c0_15] : memref<32x1xf32, #tpu.memory_space<vmem>>, vector<32x1xf32>
    %c0_16 = arith.constant 0 : index
    %c0_17 = arith.constant 0 : index
    %48 = vector.load %arg3[%c0_16, %c0_17] : memref<32x1xf32, #tpu.memory_space<vmem>>, vector<32x1xf32>
    %cst_18 = arith.constant 0.000000e+00 : f32
    %49 = vector.broadcast %cst_18 : f32 to vector<32x32xf32>
    %c0_19 = arith.constant 0 : index
    %c0_20 = arith.constant 0 : index
    %c0_21 = arith.constant 0 : index
    %50 = vector.load %arg1[%c0_19, %c0_20, %c0_21] : memref<3x32x32xf32, #tpu.memory_space<vmem>>, vector<1x32x32xf32>
    %51 = vector.shape_cast %50 : vector<1x32x32xf32> to vector<32x32xf32>
    %cst_22 = arith.constant dense<0.000000e+00> : vector<32x32xf32>
    %52 = tpu.matmul %51, %40, %cst_22 {dimension_numbers = #tpu.dot_dimension_numbers<[1], [0], [0], [1], [0, 0, 1, 1], [], []>} : vector<32x32xf32>, vector<32x32xf32>, vector<32x32xf32> -> vector<32x32xf32>
    %53 = arith.addf %49, %52 : vector<32x32xf32>
    %c1 = arith.constant 1 : index
    %c0_23 = arith.constant 0 : index
    %c0_24 = arith.constant 0 : index
    %54 = vector.load %arg1[%c1, %c0_23, %c0_24] : memref<3x32x32xf32, #tpu.memory_space<vmem>>, vector<1x32x32xf32>
    %55 = vector.shape_cast %54 : vector<1x32x32xf32> to vector<32x32xf32>
    %cst_25 = arith.constant dense<0.000000e+00> : vector<32x32xf32>
    %56 = tpu.matmul %55, %35, %cst_25 {dimension_numbers = #tpu.dot_dimension_numbers<[1], [0], [0], [1], [0, 0, 1, 1], [], []>} : vector<32x32xf32>, vector<32x32xf32>, vector<32x32xf32> -> vector<32x32xf32>
    %57 = arith.addf %53, %56 : vector<32x32xf32>
    %c2 = arith.constant 2 : index
    %c0_26 = arith.constant 0 : index
    %c0_27 = arith.constant 0 : index
    %58 = vector.load %arg1[%c2, %c0_26, %c0_27] : memref<3x32x32xf32, #tpu.memory_space<vmem>>, vector<1x32x32xf32>
    %59 = vector.shape_cast %58 : vector<1x32x32xf32> to vector<32x32xf32>
    %cst_28 = arith.constant dense<0.000000e+00> : vector<32x32xf32>
    %60 = tpu.matmul %59, %45, %cst_28 {dimension_numbers = #tpu.dot_dimension_numbers<[1], [0], [0], [1], [0, 0, 1, 1], [], []>} : vector<32x32xf32>, vector<32x32xf32>, vector<32x32xf32> -> vector<32x32xf32>
    %61 = arith.addf %57, %60 : vector<32x32xf32>
    %cst_29 = arith.constant dense<0.000000e+00> : vector<32xf32>
    %62 = vector.multi_reduction <add>, %61, %cst_29 [1] : vector<32x32xf32> to vector<32xf32>
    %63 = vector.shape_cast %62 : vector<32xf32> to vector<32x1xf32>
    %cst_30 = arith.constant 3.200000e+01 : f32
    %64 = vector.broadcast %cst_30 : f32 to vector<32x1xf32>
    %65 = arith.divf %63, %64 : vector<32x1xf32>
    %66 = vector.broadcast %65 : vector<32x1xf32> to vector<32x32xf32>
    %67 = arith.subf %61, %66 : vector<32x32xf32>
    %68 = arith.mulf %67, %67 : vector<32x32xf32>
    %cst_31 = arith.constant dense<0.000000e+00> : vector<32xf32>
    %69 = vector.multi_reduction <add>, %68, %cst_31 [1] : vector<32x32xf32> to vector<32xf32>
    %70 = vector.shape_cast %69 : vector<32xf32> to vector<32x1xf32>
    %cst_32 = arith.constant 3.200000e+01 : f32
    %71 = vector.broadcast %cst_32 : f32 to vector<32x1xf32>
    %72 = arith.divf %70, %71 : vector<32x1xf32>
    %73 = vector.broadcast %65 : vector<32x1xf32> to vector<32x32xf32>
    %74 = arith.subf %61, %73 : vector<32x32xf32>
    %cst_33 = arith.constant 9.99999974E-6 : f32
    %75 = vector.broadcast %cst_33 : f32 to vector<32x1xf32>
    %76 = arith.addf %72, %75 : vector<32x1xf32>
    %77 = math.rsqrt %76 : vector<32x1xf32>
    %78 = vector.broadcast %77 : vector<32x1xf32> to vector<32x32xf32>
    %79 = arith.mulf %74, %78 : vector<32x32xf32>
    %80 = vector.broadcast %47 : vector<32x1xf32> to vector<32x32xf32>
    %81 = arith.mulf %79, %80 : vector<32x32xf32>
    %82 = vector.broadcast %48 : vector<32x1xf32> to vector<32x32xf32>
    %83 = arith.addf %81, %82 : vector<32x32xf32>
    %cst_34 = arith.constant 0.000000e+00 : f32
    %84 = vector.broadcast %cst_34 : f32 to vector<32x32xf32>
    %85 = arith.maximumf %83, %84 : vector<32x32xf32>
    %c1_i32_35 = arith.constant 1 : i32
    %86 = tpu.dynamic_rotate %85 by %c1_i32_35 dim 1 : vector<32x32xf32>, i32 -> vector<32x32xf32>
    %cst_36 = arith.constant 0.000000e+00 : f32
    %87 = vector.shape_cast %25 : vector<1x32xi1> to vector<1x32xi1>
    %88 = vector.broadcast %87 : vector<1x32xi1> to vector<32x32xi1>
    %89 = vector.broadcast %cst_36 : f32 to vector<32x32xf32>
    %90 = arith.select %88, %86, %89 : vector<32x32xi1>, vector<32x32xf32>
    %c31_i32_37 = arith.constant 31 : i32
    %91 = tpu.dynamic_rotate %85 by %c31_i32_37 dim 1 : vector<32x32xf32>, i32 -> vector<32x32xf32>
    %cst_38 = arith.constant 0.000000e+00 : f32
    %92 = vector.shape_cast %34 : vector<1x32xi1> to vector<1x32xi1>
    %93 = vector.broadcast %92 : vector<1x32xi1> to vector<32x32xi1>
    %94 = vector.broadcast %cst_38 : f32 to vector<32x32xf32>
    %95 = arith.select %93, %91, %94 : vector<32x32xi1>, vector<32x32xf32>
    %c0_39 = arith.constant 0 : index
    %c0_40 = arith.constant 0 : index
    %c0_41 = arith.constant 0 : index
    %96 = vector.load %arg4[%c0_39, %c0_40, %c0_41] : memref<3x9x32xf32, #tpu.memory_space<vmem>>, vector<1x9x32xf32>
    %97 = vector.shape_cast %96 : vector<1x9x32xf32> to vector<9x32xf32>
    %cst_42 = arith.constant dense<0.000000e+00> : vector<9x32xf32>
    %98 = tpu.matmul %97, %90, %cst_42 {dimension_numbers = #tpu.dot_dimension_numbers<[1], [0], [0], [1], [0, 0, 1, 1], [], []>} : vector<9x32xf32>, vector<32x32xf32>, vector<9x32xf32> -> vector<9x32xf32>
    %99 = arith.addf %46, %98 : vector<9x32xf32>
    %c1_43 = arith.constant 1 : index
    %c0_44 = arith.constant 0 : index
    %c0_45 = arith.constant 0 : index
    %100 = vector.load %arg4[%c1_43, %c0_44, %c0_45] : memref<3x9x32xf32, #tpu.memory_space<vmem>>, vector<1x9x32xf32>
    %101 = vector.shape_cast %100 : vector<1x9x32xf32> to vector<9x32xf32>
    %cst_46 = arith.constant dense<0.000000e+00> : vector<9x32xf32>
    %102 = tpu.matmul %101, %85, %cst_46 {dimension_numbers = #tpu.dot_dimension_numbers<[1], [0], [0], [1], [0, 0, 1, 1], [], []>} : vector<9x32xf32>, vector<32x32xf32>, vector<9x32xf32> -> vector<9x32xf32>
    %103 = arith.addf %99, %102 : vector<9x32xf32>
    %c2_47 = arith.constant 2 : index
    %c0_48 = arith.constant 0 : index
    %c0_49 = arith.constant 0 : index
    %104 = vector.load %arg4[%c2_47, %c0_48, %c0_49] : memref<3x9x32xf32, #tpu.memory_space<vmem>>, vector<1x9x32xf32>
    %105 = vector.shape_cast %104 : vector<1x9x32xf32> to vector<9x32xf32>
    %cst_50 = arith.constant dense<0.000000e+00> : vector<9x32xf32>
    %106 = tpu.matmul %105, %95, %cst_50 {dimension_numbers = #tpu.dot_dimension_numbers<[1], [0], [0], [1], [0, 0, 1, 1], [], []>} : vector<9x32xf32>, vector<32x32xf32>, vector<9x32xf32> -> vector<9x32xf32>
    %107 = arith.addf %103, %106 : vector<9x32xf32>
    %c0_51 = arith.constant 0 : index
    %c0_52 = arith.constant 0 : index
    %108 = vector.load %arg6[%c0_51, %c0_52] : memref<32x1xf32, #tpu.memory_space<vmem>>, vector<32x1xf32>
    %c0_53 = arith.constant 0 : index
    %c0_54 = arith.constant 0 : index
    %109 = vector.load %arg7[%c0_53, %c0_54] : memref<32x1xf32, #tpu.memory_space<vmem>>, vector<32x1xf32>
    %cst_55 = arith.constant 0.000000e+00 : f32
    %110 = vector.broadcast %cst_55 : f32 to vector<32x32xf32>
    %c0_56 = arith.constant 0 : index
    %c0_57 = arith.constant 0 : index
    %c0_58 = arith.constant 0 : index
    %111 = vector.load %arg5[%c0_56, %c0_57, %c0_58] : memref<3x32x32xf32, #tpu.memory_space<vmem>>, vector<1x32x32xf32>
    %112 = vector.shape_cast %111 : vector<1x32x32xf32> to vector<32x32xf32>
    %cst_59 = arith.constant dense<0.000000e+00> : vector<32x32xf32>
    %113 = tpu.matmul %112, %40, %cst_59 {dimension_numbers = #tpu.dot_dimension_numbers<[1], [0], [0], [1], [0, 0, 1, 1], [], []>} : vector<32x32xf32>, vector<32x32xf32>, vector<32x32xf32> -> vector<32x32xf32>
    %114 = arith.addf %110, %113 : vector<32x32xf32>
    %c1_60 = arith.constant 1 : index
    %c0_61 = arith.constant 0 : index
    %c0_62 = arith.constant 0 : index
    %115 = vector.load %arg5[%c1_60, %c0_61, %c0_62] : memref<3x32x32xf32, #tpu.memory_space<vmem>>, vector<1x32x32xf32>
    %116 = vector.shape_cast %115 : vector<1x32x32xf32> to vector<32x32xf32>
    %cst_63 = arith.constant dense<0.000000e+00> : vector<32x32xf32>
    %117 = tpu.matmul %116, %35, %cst_63 {dimension_numbers = #tpu.dot_dimension_numbers<[1], [0], [0], [1], [0, 0, 1, 1], [], []>} : vector<32x32xf32>, vector<32x32xf32>, vector<32x32xf32> -> vector<32x32xf32>
    %118 = arith.addf %114, %117 : vector<32x32xf32>
    %c2_64 = arith.constant 2 : index
    %c0_65 = arith.constant 0 : index
    %c0_66 = arith.constant 0 : index
    %119 = vector.load %arg5[%c2_64, %c0_65, %c0_66] : memref<3x32x32xf32, #tpu.memory_space<vmem>>, vector<1x32x32xf32>
    %120 = vector.shape_cast %119 : vector<1x32x32xf32> to vector<32x32xf32>
    %cst_67 = arith.constant dense<0.000000e+00> : vector<32x32xf32>
    %121 = tpu.matmul %120, %45, %cst_67 {dimension_numbers = #tpu.dot_dimension_numbers<[1], [0], [0], [1], [0, 0, 1, 1], [], []>} : vector<32x32xf32>, vector<32x32xf32>, vector<32x32xf32> -> vector<32x32xf32>
    %122 = arith.addf %118, %121 : vector<32x32xf32>
    %cst_68 = arith.constant dense<0.000000e+00> : vector<32xf32>
    %123 = vector.multi_reduction <add>, %122, %cst_68 [1] : vector<32x32xf32> to vector<32xf32>
    %124 = vector.shape_cast %123 : vector<32xf32> to vector<32x1xf32>
    %cst_69 = arith.constant 3.200000e+01 : f32
    %125 = vector.broadcast %cst_69 : f32 to vector<32x1xf32>
    %126 = arith.divf %124, %125 : vector<32x1xf32>
    %127 = vector.broadcast %126 : vector<32x1xf32> to vector<32x32xf32>
    %128 = arith.subf %122, %127 : vector<32x32xf32>
    %129 = arith.mulf %128, %128 : vector<32x32xf32>
    %cst_70 = arith.constant dense<0.000000e+00> : vector<32xf32>
    %130 = vector.multi_reduction <add>, %129, %cst_70 [1] : vector<32x32xf32> to vector<32xf32>
    %131 = vector.shape_cast %130 : vector<32xf32> to vector<32x1xf32>
    %cst_71 = arith.constant 3.200000e+01 : f32
    %132 = vector.broadcast %cst_71 : f32 to vector<32x1xf32>
    %133 = arith.divf %131, %132 : vector<32x1xf32>
    %134 = vector.broadcast %126 : vector<32x1xf32> to vector<32x32xf32>
    %135 = arith.subf %122, %134 : vector<32x32xf32>
    %cst_72 = arith.constant 9.99999974E-6 : f32
    %136 = vector.broadcast %cst_72 : f32 to vector<32x1xf32>
    %137 = arith.addf %133, %136 : vector<32x1xf32>
    %138 = math.rsqrt %137 : vector<32x1xf32>
    %139 = vector.broadcast %138 : vector<32x1xf32> to vector<32x32xf32>
    %140 = arith.mulf %135, %139 : vector<32x32xf32>
    %141 = vector.broadcast %108 : vector<32x1xf32> to vector<32x32xf32>
    %142 = arith.mulf %140, %141 : vector<32x32xf32>
    %143 = vector.broadcast %109 : vector<32x1xf32> to vector<32x32xf32>
    %144 = arith.addf %142, %143 : vector<32x32xf32>
    %cst_73 = arith.constant 0.000000e+00 : f32
    %145 = vector.broadcast %cst_73 : f32 to vector<32x32xf32>
    %146 = arith.maximumf %144, %145 : vector<32x32xf32>
    %c1_i32_74 = arith.constant 1 : i32
    %147 = tpu.dynamic_rotate %146 by %c1_i32_74 dim 1 : vector<32x32xf32>, i32 -> vector<32x32xf32>
    %cst_75 = arith.constant 0.000000e+00 : f32
    %148 = vector.shape_cast %25 : vector<1x32xi1> to vector<1x32xi1>
    %149 = vector.broadcast %148 : vector<1x32xi1> to vector<32x32xi1>
    %150 = vector.broadcast %cst_75 : f32 to vector<32x32xf32>
    %151 = arith.select %149, %147, %150 : vector<32x32xi1>, vector<32x32xf32>
    %c31_i32_76 = arith.constant 31 : i32
    %152 = tpu.dynamic_rotate %146 by %c31_i32_76 dim 1 : vector<32x32xf32>, i32 -> vector<32x32xf32>
    %cst_77 = arith.constant 0.000000e+00 : f32
    %153 = vector.shape_cast %34 : vector<1x32xi1> to vector<1x32xi1>
    %154 = vector.broadcast %153 : vector<1x32xi1> to vector<32x32xi1>
    %155 = vector.broadcast %cst_77 : f32 to vector<32x32xf32>
    %156 = arith.select %154, %152, %155 : vector<32x32xi1>, vector<32x32xf32>
    %c0_78 = arith.constant 0 : index
    %c0_79 = arith.constant 0 : index
    %c0_80 = arith.constant 0 : index
    %157 = vector.load %arg8[%c0_78, %c0_79, %c0_80] : memref<3x9x32xf32, #tpu.memory_space<vmem>>, vector<1x9x32xf32>
    %158 = vector.shape_cast %157 : vector<1x9x32xf32> to vector<9x32xf32>
    %cst_81 = arith.constant dense<0.000000e+00> : vector<9x32xf32>
    %159 = tpu.matmul %158, %151, %cst_81 {dimension_numbers = #tpu.dot_dimension_numbers<[1], [0], [0], [1], [0, 0, 1, 1], [], []>} : vector<9x32xf32>, vector<32x32xf32>, vector<9x32xf32> -> vector<9x32xf32>
    %160 = arith.addf %107, %159 : vector<9x32xf32>
    %c1_82 = arith.constant 1 : index
    %c0_83 = arith.constant 0 : index
    %c0_84 = arith.constant 0 : index
    %161 = vector.load %arg8[%c1_82, %c0_83, %c0_84] : memref<3x9x32xf32, #tpu.memory_space<vmem>>, vector<1x9x32xf32>
    %162 = vector.shape_cast %161 : vector<1x9x32xf32> to vector<9x32xf32>
    %cst_85 = arith.constant dense<0.000000e+00> : vector<9x32xf32>
    %163 = tpu.matmul %162, %146, %cst_85 {dimension_numbers = #tpu.dot_dimension_numbers<[1], [0], [0], [1], [0, 0, 1, 1], [], []>} : vector<9x32xf32>, vector<32x32xf32>, vector<9x32xf32> -> vector<9x32xf32>
    %164 = arith.addf %160, %163 : vector<9x32xf32>
    %c2_86 = arith.constant 2 : index
    %c0_87 = arith.constant 0 : index
    %c0_88 = arith.constant 0 : index
    %165 = vector.load %arg8[%c2_86, %c0_87, %c0_88] : memref<3x9x32xf32, #tpu.memory_space<vmem>>, vector<1x9x32xf32>
    %166 = vector.shape_cast %165 : vector<1x9x32xf32> to vector<9x32xf32>
    %cst_89 = arith.constant dense<0.000000e+00> : vector<9x32xf32>
    %167 = tpu.matmul %166, %156, %cst_89 {dimension_numbers = #tpu.dot_dimension_numbers<[1], [0], [0], [1], [0, 0, 1, 1], [], []>} : vector<9x32xf32>, vector<32x32xf32>, vector<9x32xf32> -> vector<9x32xf32>
    %168 = arith.addf %164, %167 : vector<9x32xf32>
    %c0_90 = arith.constant 0 : index
    %c0_91 = arith.constant 0 : index
    %169 = vector.load %arg10[%c0_90, %c0_91] : memref<32x1xf32, #tpu.memory_space<vmem>>, vector<32x1xf32>
    %c0_92 = arith.constant 0 : index
    %c0_93 = arith.constant 0 : index
    %170 = vector.load %arg11[%c0_92, %c0_93] : memref<32x1xf32, #tpu.memory_space<vmem>>, vector<32x1xf32>
    %cst_94 = arith.constant 0.000000e+00 : f32
    %171 = vector.broadcast %cst_94 : f32 to vector<32x32xf32>
    %c0_95 = arith.constant 0 : index
    %c0_96 = arith.constant 0 : index
    %c0_97 = arith.constant 0 : index
    %172 = vector.load %arg9[%c0_95, %c0_96, %c0_97] : memref<3x32x32xf32, #tpu.memory_space<vmem>>, vector<1x32x32xf32>
    %173 = vector.shape_cast %172 : vector<1x32x32xf32> to vector<32x32xf32>
    %cst_98 = arith.constant dense<0.000000e+00> : vector<32x32xf32>
    %174 = tpu.matmul %173, %40, %cst_98 {dimension_numbers = #tpu.dot_dimension_numbers<[1], [0], [0], [1], [0, 0, 1, 1], [], []>} : vector<32x32xf32>, vector<32x32xf32>, vector<32x32xf32> -> vector<32x32xf32>
    %175 = arith.addf %171, %174 : vector<32x32xf32>
    %c1_99 = arith.constant 1 : index
    %c0_100 = arith.constant 0 : index
    %c0_101 = arith.constant 0 : index
    %176 = vector.load %arg9[%c1_99, %c0_100, %c0_101] : memref<3x32x32xf32, #tpu.memory_space<vmem>>, vector<1x32x32xf32>
    %177 = vector.shape_cast %176 : vector<1x32x32xf32> to vector<32x32xf32>
    %cst_102 = arith.constant dense<0.000000e+00> : vector<32x32xf32>
    %178 = tpu.matmul %177, %35, %cst_102 {dimension_numbers = #tpu.dot_dimension_numbers<[1], [0], [0], [1], [0, 0, 1, 1], [], []>} : vector<32x32xf32>, vector<32x32xf32>, vector<32x32xf32> -> vector<32x32xf32>
    %179 = arith.addf %175, %178 : vector<32x32xf32>
    %c2_103 = arith.constant 2 : index
    %c0_104 = arith.constant 0 : index
    %c0_105 = arith.constant 0 : index
    %180 = vector.load %arg9[%c2_103, %c0_104, %c0_105] : memref<3x32x32xf32, #tpu.memory_space<vmem>>, vector<1x32x32xf32>
    %181 = vector.shape_cast %180 : vector<1x32x32xf32> to vector<32x32xf32>
    %cst_106 = arith.constant dense<0.000000e+00> : vector<32x32xf32>
    %182 = tpu.matmul %181, %45, %cst_106 {dimension_numbers = #tpu.dot_dimension_numbers<[1], [0], [0], [1], [0, 0, 1, 1], [], []>} : vector<32x32xf32>, vector<32x32xf32>, vector<32x32xf32> -> vector<32x32xf32>
    %183 = arith.addf %179, %182 : vector<32x32xf32>
    %cst_107 = arith.constant dense<0.000000e+00> : vector<32xf32>
    %184 = vector.multi_reduction <add>, %183, %cst_107 [1] : vector<32x32xf32> to vector<32xf32>
    %185 = vector.shape_cast %184 : vector<32xf32> to vector<32x1xf32>
    %cst_108 = arith.constant 3.200000e+01 : f32
    %186 = vector.broadcast %cst_108 : f32 to vector<32x1xf32>
    %187 = arith.divf %185, %186 : vector<32x1xf32>
    %188 = vector.broadcast %187 : vector<32x1xf32> to vector<32x32xf32>
    %189 = arith.subf %183, %188 : vector<32x32xf32>
    %190 = arith.mulf %189, %189 : vector<32x32xf32>
    %cst_109 = arith.constant dense<0.000000e+00> : vector<32xf32>
    %191 = vector.multi_reduction <add>, %190, %cst_109 [1] : vector<32x32xf32> to vector<32xf32>
    %192 = vector.shape_cast %191 : vector<32xf32> to vector<32x1xf32>
    %cst_110 = arith.constant 3.200000e+01 : f32
    %193 = vector.broadcast %cst_110 : f32 to vector<32x1xf32>
    %194 = arith.divf %192, %193 : vector<32x1xf32>
    %195 = vector.broadcast %187 : vector<32x1xf32> to vector<32x32xf32>
    %196 = arith.subf %183, %195 : vector<32x32xf32>
    %cst_111 = arith.constant 9.99999974E-6 : f32
    %197 = vector.broadcast %cst_111 : f32 to vector<32x1xf32>
    %198 = arith.addf %194, %197 : vector<32x1xf32>
    %199 = math.rsqrt %198 : vector<32x1xf32>
    %200 = vector.broadcast %199 : vector<32x1xf32> to vector<32x32xf32>
    %201 = arith.mulf %196, %200 : vector<32x32xf32>
    %202 = vector.broadcast %169 : vector<32x1xf32> to vector<32x32xf32>
    %203 = arith.mulf %201, %202 : vector<32x32xf32>
    %204 = vector.broadcast %170 : vector<32x1xf32> to vector<32x32xf32>
    %205 = arith.addf %203, %204 : vector<32x32xf32>
    %cst_112 = arith.constant 0.000000e+00 : f32
    %206 = vector.broadcast %cst_112 : f32 to vector<32x32xf32>
    %207 = arith.maximumf %205, %206 : vector<32x32xf32>
    %c1_i32_113 = arith.constant 1 : i32
    %208 = tpu.dynamic_rotate %207 by %c1_i32_113 dim 1 : vector<32x32xf32>, i32 -> vector<32x32xf32>
    %cst_114 = arith.constant 0.000000e+00 : f32
    %209 = vector.shape_cast %25 : vector<1x32xi1> to vector<1x32xi1>
    %210 = vector.broadcast %209 : vector<1x32xi1> to vector<32x32xi1>
    %211 = vector.broadcast %cst_114 : f32 to vector<32x32xf32>
    %212 = arith.select %210, %208, %211 : vector<32x32xi1>, vector<32x32xf32>
    %c31_i32_115 = arith.constant 31 : i32
    %213 = tpu.dynamic_rotate %207 by %c31_i32_115 dim 1 : vector<32x32xf32>, i32 -> vector<32x32xf32>
    %cst_116 = arith.constant 0.000000e+00 : f32
    %214 = vector.shape_cast %34 : vector<1x32xi1> to vector<1x32xi1>
    %215 = vector.broadcast %214 : vector<1x32xi1> to vector<32x32xi1>
    %216 = vector.broadcast %cst_116 : f32 to vector<32x32xf32>
    %217 = arith.select %215, %213, %216 : vector<32x32xi1>, vector<32x32xf32>
    %c0_117 = arith.constant 0 : index
    %c0_118 = arith.constant 0 : index
    %c0_119 = arith.constant 0 : index
    %218 = vector.load %arg12[%c0_117, %c0_118, %c0_119] : memref<3x9x32xf32, #tpu.memory_space<vmem>>, vector<1x9x32xf32>
    %219 = vector.shape_cast %218 : vector<1x9x32xf32> to vector<9x32xf32>
    %cst_120 = arith.constant dense<0.000000e+00> : vector<9x32xf32>
    %220 = tpu.matmul %219, %212, %cst_120 {dimension_numbers = #tpu.dot_dimension_numbers<[1], [0], [0], [1], [0, 0, 1, 1], [], []>} : vector<9x32xf32>, vector<32x32xf32>, vector<9x32xf32> -> vector<9x32xf32>
    %221 = arith.addf %168, %220 : vector<9x32xf32>
    %c1_121 = arith.constant 1 : index
    %c0_122 = arith.constant 0 : index
    %c0_123 = arith.constant 0 : index
    %222 = vector.load %arg12[%c1_121, %c0_122, %c0_123] : memref<3x9x32xf32, #tpu.memory_space<vmem>>, vector<1x9x32xf32>
    %223 = vector.shape_cast %222 : vector<1x9x32xf32> to vector<9x32xf32>
    %cst_124 = arith.constant dense<0.000000e+00> : vector<9x32xf32>
    %224 = tpu.matmul %223, %207, %cst_124 {dimension_numbers = #tpu.dot_dimension_numbers<[1], [0], [0], [1], [0, 0, 1, 1], [], []>} : vector<9x32xf32>, vector<32x32xf32>, vector<9x32xf32> -> vector<9x32xf32>
    %225 = arith.addf %221, %224 : vector<9x32xf32>
    %c2_125 = arith.constant 2 : index
    %c0_126 = arith.constant 0 : index
    %c0_127 = arith.constant 0 : index
    %226 = vector.load %arg12[%c2_125, %c0_126, %c0_127] : memref<3x9x32xf32, #tpu.memory_space<vmem>>, vector<1x9x32xf32>
    %227 = vector.shape_cast %226 : vector<1x9x32xf32> to vector<9x32xf32>
    %cst_128 = arith.constant dense<0.000000e+00> : vector<9x32xf32>
    %228 = tpu.matmul %227, %217, %cst_128 {dimension_numbers = #tpu.dot_dimension_numbers<[1], [0], [0], [1], [0, 0, 1, 1], [], []>} : vector<9x32xf32>, vector<32x32xf32>, vector<9x32xf32> -> vector<9x32xf32>
    %229 = arith.addf %225, %228 : vector<9x32xf32>
    %c0_129 = arith.constant 0 : index
    %c0_130 = arith.constant 0 : index
    %230 = vector.load %arg13[%c0_129, %c0_130] : memref<9x1xf32, #tpu.memory_space<vmem>>, vector<9x1xf32>
    %231 = vector.broadcast %230 : vector<9x1xf32> to vector<9x32xf32>
    %232 = arith.addf %229, %231 : vector<9x32xf32>
    %c0_131 = arith.constant 0 : index
    %c0_132 = arith.constant 0 : index
    %233 = vector.load %arg14[%c0_131, %c0_132] : memref<9x32xf32, #tpu.memory_space<vmem>>, vector<9x32xf32>
    tpu.vector_store %arg14[%c0_131, %c0_132], %232 {strides = array<i32>} : memref<9x32xf32, #tpu.memory_space<vmem>>, vector<9x32xf32>,
    return
  }
}

</mosaic_0001>

<bundles_post_ra>
// kernel: _fused_forward.1
= control target key start
LH: loop header
LB: loop body
LE: loop exit
PB: predicated region body
PF: predicated region fallthrough
CT: control target
= control target key end

     0   :  { %s1689_s17 = smov 32   ;;  %vm73_vm0 = vcmask 1047808   ;;  %s1691_s22 = smov 97   ;;  %v47_v20 = vlaneseq  ;;  %vm155_vm3 = vcmask 261120   ;;  %v1692_v47 = vmov 0   ;;  %s2549_s0 = inlined_call_operand.vmem [shape: f32[32,32], index: 0, kind: input, shape index: {}]   ;;  %s2550_s1 = inlined_call_operand.vmem [shape: f32[3,32,32], index: 1, kind: input, shape index: {}]   ;;  %s2551_s2 = inlined_call_operand.vmem [shape: f32[32,1], index: 2, kind: input, shape index: {}]   ;;  %s2552_s3 = inlined_call_operand.vmem [shape: f32[32,1], index: 3, kind: input, shape index: {}]   ;;  %s2553_s6 = inlined_call_operand.vmem [shape: f32[32,1], index: 6, kind: input, shape index: {}]   ;;  %s2554_s4 = inlined_call_operand.vmem [shape: f32[3,9,32], index: 4, kind: input, shape index: {}]   ;;  %s2555_s5 = inlined_call_operand.vmem [shape: f32[3,32,32], index: 5, kind: input, shape index: {}]   ;;  %s2556_s7 = inlined_call_operand.vmem [shape: f32[32,1], index: 7, kind: input, shape index: {}]   ;;  %s2557_s10 = inlined_call_operand.vmem [shape: f32[32,1], index: 10, kind: input, shape index: {}]   ;;  %s2558_s9 = inlined_call_operand.vmem [shape: f32[3,32,32], index: 9, kind: input, shape index: {}]   ;;  %s2559_s8 = inlined_call_operand.vmem [shape: f32[3,9,32], index: 8, kind: input, shape index: {}]   ;;  %s2560_s11 = inlined_call_operand.vmem [shape: f32[32,1], index: 11, kind: input, shape index: {}]   ;;  %s2561_s13 = inlined_call_operand.vmem [shape: f32[9,1], index: 13, kind: input, shape index: {}]   ;;  %s2562_s12 = inlined_call_operand.vmem [shape: f32[3,9,32], index: 12, kind: input, shape index: {}]   ;;  %s2563_s14 = inlined_call_operand.vmem [shape: f32[9,32], index: 14, kind: output, shape index: {}]  }
   0x1   :  { %v1772_v0 = vld [vmem:[%s2549_s0 + $0x18] sm:$0xff]  ;;  %v1777_v1 = vld [vmem:[%s2549_s0 + $0x8] sm:$0xff]  ;;  %v1787_v2 = vld [vmem:[%s2549_s0 + $0x10] sm:$0xff]  ;;  %1660 = vset.pattern.permute.xlu2 %v1692_v47  ;;  %1662 = vset.pattern.permute.xlu1 %v1692_v47 }
   0x2   :  { %83 = vrot.lane.b32.xlu0 %v1772_v0, %s1689_s17  ;;  %77 = vrot.lane.b32.xlu1 %v1777_v1, %s1689_s17  ;;  %v1793_v3 = vld [vmem:[%s2549_s0] sm:$0xff]  ;;  %s1690_s0 = smov 127   ;;  %v48_v21 = vand.u32 127, %v47_v20  ;;  %v1514_v30 = vld [vmem:[%s2550_s1 + $0x28] sm:$0xff] }
   0x3   :  { %180 = vmatpush.msra.mxu0 %v1772_v0  ;;  %v1513_v27 = vld [vmem:[%s2550_s1 + $0x20] sm:$0xff]  ;;  %v1515_v33 = vld [vmem:[%s2550_s1 + $0x30] sm:$0xff]  ;;  %v1516_v34 = vld [vmem:[%s2550_s1 + $0x38] sm:$0xff]  ;;  %1661 = vset.pattern.permute.xlu0 %v1692_v47 }
   0x4   :  { %v53_v22 = vand.u32 15, %v48_v21  ;;  %v146_v35 = vld [vmem:[%s2550_s1] sm:$0xff]  ;;  %v147_v39 = vld [vmem:[%s2550_s1 + $0x8] sm:$0xff]  ;;  %v148_v41 = vld [vmem:[%s2550_s1 + $0x10] sm:$0xff] }
   0x5   :  { %181 = vmatpush.msra.mxu0 %v1787_v2  ;;  %v1529_v37 = vld [vmem:[%s2550_s1 + $0x40] sm:$0xff]  ;;  %v1530_v40 = vld [vmem:[%s2550_s1 + $0x48] sm:$0xff]  ;;  %v1531_v42 = vld [vmem:[%s2550_s1 + $0x50] sm:$0xff] }
   0x6   :  { %v1829_v23 = vadd.s32 1, %v53_v22  ;;  %v1837_v25 = vadd.s32 4294967295, %v53_v22  ;;  %v149_v43 = vld [vmem:[%s2550_s1 + $0x18] sm:$0xff] }
   0x7   :  { %182 = vmatpush.msra.mxu0 %v1777_v1  ;;  %v1532_v44 = vld [vmem:[%s2550_s1 + $0x58] sm:$0xff] }
   0x8   :  { %vm67_vm1 = vcmp.lt.s32.totalorder %v1829_v23, 16  ;;  %vm62_vm2 = vcmp.ge.s32.totalorder %v1837_v25, 0  ;;  %v1392_v25 = vld [vmem:[%s2562_s12 + $0x8] sm:$0x1] }
   0x9   :  { %183 = vmatpush.msra.mxu0 %v1793_v3 }
   0xa   :  { %80 = vrot.lane.b32.xlu0 %v1787_v2, %s1689_s17  ;;  %74 = vrot.lane.b32.xlu1 %v1793_v3, %s1689_s17 }
   0xb   :  { %1517 = vmatmul.msk.f32.vlgmr.msra.gmra.mxu0 %vm155_vm3, %v1513_v27 }
  0x13   :  { %1518 = vmatmul.msk.f32.gmra.mxu0 %vm155_vm3, %v1514_v30 }
  0x1b   :  { %1519 = vmatmul.msk.f32.gmra.mxu0 %vm155_vm3, %v1515_v33 }
  0x23   :  { %1520 = vmatmul.msk.f32.gmra.mxu0 %vm155_vm3, %v1516_v34  ;;  %v145_v34 = vld [vmem:[%s2552_s3 + $0x18] sm:$0xff] }
  0x74   :  { %v84_v4 = vpop.permute.xlu0 %83  ;;  %v78_v5 = vpop.permute.xlu1 %77 }
  0x75   :  { %v85_v6 = vsel %vm73_vm0, %v84_v4, %v1772_v0  ;;  %v79_v7 = vsel %vm73_vm0, %v78_v5, %v1777_v1 }
  0x76   :  { %92 = vrot.lane.b32.xlu2 %v85_v6, %s1689_s17  ;;  %88 = vrot.lane.b32.xlu0 %v79_v7, %s1689_s17  ;;  %v139_v7 = vld [vmem:[%s2551_s2 + $0x8] sm:$0xff] }
  0x7c   :  { %v81_v8 = vpop.permute.xlu0 %80  ;;  %v75_v9 = vpop.permute.xlu1 %74 }
  0x7d   :  { %v82_v10 = vsel %vm73_vm0, %v81_v8, %v1787_v2  ;;  %v76_v11 = vsel %vm73_vm0, %v75_v9, %v1793_v3  ;;  %v1693_v8 = vmov 32.0  }
  0x7e   :  { %90 = vrot.lane.b32.xlu2 %v82_v10, %s1689_s17  ;;  %86 = vrot.lane.b32.xlu1 %v76_v11, %s1689_s17  ;;  %1663 = vrcp.f32 %v1693_v8  ;;  %v138_v10 = vld [vmem:[%s2551_s2] sm:$0xff] }
  0x84   :  { %v1664_v9 = vpop.eup %1663 }
  0x85   :  { %v301_v11 = vmul.f32 32.0, %v1664_v9  ;;  %vm305_vm4 = vweird.f32 %v1664_v9 }
  0x88   :  { %v185_v45 = vpop.f32.mrf.mxu0 }
  0x90   :  { %v188_v49 = vpop.f32.mrf.mxu0 }
  0x98   :  { %v191_v56 = vpop.f32.mrf.mxu0 }
  0xa0   :  { %v194_v61 = vpop.f32.mrf.mxu0 }
  0xd0   :  { %v93_v12 = vpop.permute.xlu2 %92 }
  0xd1   :  { %v97_v13 = vsel %vm73_vm0, %v93_v12, %v1772_v0  ;;  %v302_v12 = vsub.f32 1.0, %v301_v11 }
  0xd2   :  { %128 = vrot.lane.b32.xlu2 %v97_v13, %s1690_s0  ;;  %110 = vrot.lane.b32.xlu1 %v97_v13, %s1691_s22 }
  0xd3   :  { %v303_v13 = vmul.f32 %v1664_v9, %v302_v12 }
  0xd8   :  { %v91_v14 = vpop.permute.xlu2 %90 }
  0xd9   :  { %v96_v15 = vsel %vm73_vm0, %v91_v14, %v1787_v2  ;;  %v304_v14 = vadd.f32 %v1664_v9, %v303_v13 }
  0xda   :  { %126 = vrot.lane.b32.xlu0 %v96_v15, %s1690_s0 }
  0xe2   :  { %108 = vrot.lane.b32.xlu0 %v96_v15, %s1691_s22  ;;  %v1956_v15 = vsel %vm305_vm4, %v1664_v9, %v304_v14 }
  0xe8   :  { %v89_v16 = vpop.permute.xlu0 %88 }
  0xe9   :  { %v95_v17 = vsel %vm73_vm0, %v89_v16, %v1777_v1 }
  0xea   :  { %124 = vrot.lane.b32.xlu2 %v95_v17, %s1690_s0 }
  0xf0   :  { %v87_v18 = vpop.permute.xlu1 %86 }
  0xf1   :  { %v94_v19 = vsel %vm73_vm0, %v87_v18, %v1793_v3 }
  0xf2   :  { %106 = vrot.lane.b32.xlu2 %v95_v17, %s1691_s22  ;;  %104 = vrot.lane.b32.xlu0 %v94_v19, %s1691_s22 }
  0xf3   :  { %122 = vrot.lane.b32.xlu1 %v94_v19, %s1690_s0 }
 0x12c   :  { %v1832_v24 = vpop.permute.xlu2 %128 }
 0x12d   :  { %1533 = vmatpush.msk.msra.mxu2 %vm67_vm1, %v1832_v24 }
 0x144   :  { %v1840_v26 = vpop.permute.xlu1 %110  ;;  %v1849_v28 = vpop.permute.xlu2 %124 }
 0x145   :  { %1521 = vmatpush.msk.msra.mxu1 %vm62_vm2, %v1840_v26 }
 0x14c   :  { %v1851_v29 = vpop.permute.xlu0 %126  ;;  %v1868_v32 = vpop.permute.xlu2 %106 }
 0x14d   :  { %1534 = vmatpush.msk.msra.mxu2 %vm67_vm1, %v1851_v29 }
 0x14f   :  { %1535 = vmatpush.msk.msra.mxu2 %vm67_vm1, %v1849_v28 }
 0x154   :  { %v1863_v31 = vpop.permute.xlu0 %108 }
 0x155   :  { %1522 = vmatpush.msk.msra.mxu1 %vm62_vm2, %v1863_v31 }
 0x157   :  { %1523 = vmatpush.msk.msra.mxu1 %vm62_vm2, %v1868_v32 }
 0x164   :  { %v1884_v36 = vpop.permute.xlu0 %104 }
 0x165   :  { %v1889_v38 = vpop.permute.xlu1 %122  ;;  %1524 = vmatpush.msk.msra.mxu1 %vm62_vm2, %v1884_v36 }
 0x166   :  { %1536 = vmatpush.msk.msra.mxu2 %vm67_vm1, %v1889_v38  ;;  %1525 = vmatmul.msk.f32.vlgmr.msra.gmra.mxu1 %vm155_vm3, %v146_v35  ;;  %v144_v35 = vld [vmem:[%s2552_s3 + $0x10] sm:$0xff] }
 0x167   :  { %1537 = vmatmul.msk.f32.vlgmr.msra.gmra.mxu2 %vm155_vm3, %v1529_v37  ;;  %633 = vmatpush.msrb.mxu1 %v1772_v0 }
 0x168   :  { %1567 = vmatpush.msk.msrb.mxu2 %vm62_vm2, %v1840_v26 }
 0x169   :  { %634 = vmatpush.msrb.mxu1 %v1787_v2 }
 0x16a   :  { %1568 = vmatpush.msk.msrb.mxu2 %vm62_vm2, %v1863_v31 }
 0x16b   :  { %635 = vmatpush.msrb.mxu1 %v1777_v1 }
 0x16c   :  { %1569 = vmatpush.msk.msrb.mxu2 %vm62_vm2, %v1868_v32 }
 0x16d   :  { %636 = vmatpush.msrb.mxu1 %v1793_v3 }
 0x16e   :  { %1570 = vmatpush.msk.msrb.mxu2 %vm62_vm2, %v1884_v36  ;;  %1526 = vmatmul.msk.f32.gmra.mxu1 %vm155_vm3, %v147_v39 }
 0x16f   :  { %1538 = vmatmul.msk.f32.gmra.mxu2 %vm155_vm3, %v1530_v40  ;;  %v140_v40 = vld [vmem:[%s2551_s2 + $0x10] sm:$0xff] }
 0x170   :  { %1083 = vmatpush.msra.mxu2 %v1772_v0 }
 0x172   :  { %1084 = vmatpush.msra.mxu2 %v1787_v2  ;;  %v141_v2 = vld [vmem:[%s2551_s2 + $0x18] sm:$0xff] }
 0x174   :  { %1085 = vmatpush.msra.mxu2 %v1777_v1 }
 0x176   :  { %1527 = vmatmul.msk.f32.gmra.mxu1 %vm155_vm3, %v148_v41  ;;  %1086 = vmatpush.msra.mxu2 %v1793_v3 }
 0x177   :  { %1539 = vmatmul.msk.f32.gmra.mxu2 %vm155_vm3, %v1531_v42 }
 0x17e   :  { %1528 = vmatmul.msk.f32.gmra.mxu1 %vm155_vm3, %v149_v43 }
 0x17f   :  { %1540 = vmatmul.msk.f32.gmra.mxu2 %vm155_vm3, %v1532_v44 }
 0x1e3   :  { %v226_v46 = vpop.f32.mrf.mxu1 }
 0x1e4   :  { %v227_v48 = vadd.f32 %v226_v46, %v185_v45 }
 0x1ea   :  { %v272_v50 = vpop.f32.mrf.mxu2 }
 0x1eb   :  { %v284_v51 = vadd.f32 %v272_v50, %v227_v48  ;;  %v229_v52 = vpop.f32.mrf.mxu1  ;;  %v142_v50 = vld [vmem:[%s2552_s3] sm:$0xff] }
 0x1ec   :  { %v230_v54 = vadd.f32 %v229_v52, %v188_v49 }
 0x1ed   :  { %v288_v53 = vsel %vm155_vm3, %v284_v51, 0.0 }
 0x1ee   :  { %289 = vadd.xlane.f32.xlu2 %v288_v53 }
 0x1f2   :  { %v275_v55 = vpop.f32.mrf.mxu2 }
 0x1f3   :  { %v285_v57 = vadd.f32 %v275_v55, %v230_v54  ;;  %v232_v58 = vpop.f32.mrf.mxu1 }
 0x1f4   :  { %v233_v4 = vadd.f32 %v232_v58, %v191_v56 }
 0x1f5   :  { %v291_v59 = vsel %vm155_vm3, %v285_v57, 0.0 }
 0x1f6   :  { %292 = vadd.xlane.f32.xlu0 %v291_v59 }
 0x1fa   :  { %v278_v60 = vpop.f32.mrf.mxu2 }
 0x1fb   :  { %v235_v62 = vpop.f32.mrf.mxu1  ;;  %v286_v5 = vadd.f32 %v278_v60, %v233_v4 }
 0x1fc   :  { %v236_v63 = vadd.f32 %v235_v62, %v194_v61 }
 0x1fd   :  { %v294_v6 = vsel %vm155_vm3, %v286_v5, 0.0 }
 0x202   :  { %v281_v0 = vpop.f32.mrf.mxu2 }
 0x203   :  { %v287_v1 = vadd.f32 %v281_v0, %v236_v63 }
 0x205   :  { %v297_v3 = vsel %vm155_vm3, %v287_v1, 0.0 }
 0x206   :  { %400 = vperm.xlu2 %1660, %v141_v2   ;;  %298 = vadd.xlane.f32.xlu1 %v297_v3 }
 0x22f   :  { %295 = vadd.xlane.f32.xlu2 %v294_v6 }
 0x247   :  { %390 = vperm.xlu2 %1660, %v139_v7  }
 0x24f   :  { %385 = vperm.xlu2 %1660, %v138_v10  }
 0x261   :  { %v290_v16 = vpop.xlane.xlu2 %289 }
 0x262   :  { %v307_v17 = vmul.f32 %v1956_v15, %v290_v16 }
 0x264   :  { %v1959_v18 = vsub.f32 %v284_v51, %v307_v17  ;;  %v143_v51 = vld [vmem:[%s2552_s3 + $0x8] sm:$0xff] }
 0x266   :  { %v315_v19 = vmul.f32 %v1959_v18, %v1959_v18 }
 0x268   :  { %v319_v20 = vsel %vm155_vm3, %v315_v19, 0.0 }
 0x269   :  { %v293_v21 = vpop.xlane.xlu0 %292  ;;  %320 = vadd.xlane.f32.xlu1 %v319_v20  ;;  %v1976_v37 = vpop.permute.xlu2 %400 }
 0x26a   :  { %v308_v22 = vmul.f32 %v1956_v15, %v293_v21 }
 0x26c   :  { %v1965_v27 = vsub.f32 %v285_v57, %v308_v22 }
 0x26e   :  { %v316_v30 = vmul.f32 %v1965_v27, %v1965_v27 }
 0x270   :  { %v322_v33 = vsel %vm155_vm3, %v316_v30, 0.0 }
 0x271   :  { %323 = vadd.xlane.f32.xlu0 %v322_v33 }
 0x279   :  { %v299_v42 = vpop.xlane.xlu1 %298 }
 0x27a   :  { %v310_v44 = vmul.f32 %v1956_v15, %v299_v42 }
 0x27c   :  { %v1984_v47 = vsub.f32 %v287_v1, %v310_v44 }
 0x27e   :  { %v318_v48 = vmul.f32 %v1984_v47, %v1984_v47 }
 0x280   :  { %v328_v49 = vsel %vm155_vm3, %v318_v48, 0.0 }
 0x282   :  { %424 = vperm.xlu1 %1662, %v145_v34  }
 0x285   :  { %395 = vperm.xlu0 %1661, %v140_v40  }
 0x28a   :  { %419 = vperm.xlu1 %1662, %v144_v35  }
 0x2a2   :  { %v296_v39 = vpop.xlane.xlu2 %295 }
 0x2a3   :  { %v309_v41 = vmul.f32 %v1956_v15, %v296_v39 }
 0x2a5   :  { %v313_v43 = vsub.f32 %v286_v5, %v309_v41 }
 0x2a7   :  { %v317_v45 = vmul.f32 %v313_v43, %v313_v43 }
 0x2a9   :  { %v325_v46 = vsel %vm155_vm3, %v317_v45, 0.0 }
 0x2aa   :  { %326 = vadd.xlane.f32.xlu2 %v325_v46  ;;  %v1995_v52 = vpop.permute.xlu2 %390 }
 0x2b2   :  { %v1998_v56 = vpop.permute.xlu2 %385 }
 0x2b4   :  { %329 = vadd.xlane.f32.xlu1 %v328_v49 }
 0x2c2   :  { %409 = vperm.xlu2 %1660, %v142_v50  }
 0x2cd   :  { %414 = vperm.xlu1 %1662, %v143_v51  }
 0x2dc   :  { %v321_v53 = vpop.xlane.xlu1 %320 }
 0x2dd   :  { %v331_v59 = vmul.f32 %v321_v53, %v1956_v15 }
 0x2df   :  { %v335_v60 = vadd.f32 1e-05, %v331_v59 }
 0x2e1   :  { %vm345_vm13 = vweird.f32 %v335_v60 }
 0x2e4   :  { %v324_v54 = vpop.xlane.xlu0 %323 }
 0x2e5   :  { %v332_v55 = vmul.f32 %v324_v54, %v1956_v15 }
 0x2e7   :  { %v336_v58 = vadd.f32 1e-05, %v332_v55 }
 0x2e9   :  { %1665 = vrsqrt.f32 %v336_v58  ;;  %vm355_vm9 = vweird.f32 %v336_v58 }
 0x2ea   :  { %1667 = vrsqrt.f32 %v335_v60 }
 0x2ef   :  { %v1666_v0 = vpop.eup %1665 }
 0x2f0   :  { %v350_v2 = vmul.f32 %v1666_v0, %v336_v58  ;;  %v1668_v3 = vpop.eup %1667  ;;  %vm356_vm8 = vweird.f32 %v1666_v0 }
 0x2f1   :  { %v340_v8 = vmul.f32 %v1668_v3, %v335_v60  ;;  %vm357_vm10 = vmor %vm355_vm9, %vm356_vm8  ;;  %vm346_vm11 = vweird.f32 %v1668_v3 }
 0x2f2   :  { %v351_v4 = vmul.f32 %v1666_v0, %v350_v2  ;;  %vm347_vm14 = vmor %vm345_vm13, %vm346_vm11 }
 0x2f3   :  { %v341_v13 = vmul.f32 %v1668_v3, %v340_v8 }
 0x2f4   :  { %v2000_v57 = vpop.permute.xlu1 %424  ;;  %v352_v11 = vmul.f32 0.5, %v351_v4 }
 0x2f5   :  { %v342_v19 = vmul.f32 0.5, %v341_v13 }
 0x2f6   :  { %v353_v16 = vsub.f32 1.5, %v352_v11 }
 0x2f7   :  { %v396_v30 = vpop.permute.xlu0 %395  ;;  %v343_v39 = vsub.f32 1.5, %v342_v19  ;;  %v1542_v19 = vld [vmem:[%s2554_s4 + $0x18] sm:$0x1] }
 0x2f8   :  { %v354_v34 = vmul.f32 %v1666_v0, %v353_v16  ;;  %v595_v16 = vld [vmem:[%s2553_s6 + $0x18] sm:$0xff] }
 0x2f9   :  { %v344_v46 = vmul.f32 %v1668_v3, %v343_v39  ;;  %v496_v39 = vld [vmem:[%s2554_s4 + $0x8] sm:$0x1] }
 0x2fa   :  { %v358_v44 = vsel %vm357_vm10, %v1666_v0, %v354_v34 }
 0x2fb   :  { %v380_v50 = vmul.f32 %v358_v44, %v1965_v27 }
 0x2fc   :  { %v420_v63 = vpop.permute.xlu1 %419 }
 0x2fd   :  { %v404_v55 = vmul.f32 %v1995_v52, %v380_v50  ;;  %v1552_v50 = vld [vmem:[%s2554_s4 + $0x28] sm:$0x1] }
 0x31d   :  { %v327_v61 = vpop.xlane.xlu2 %326 }
 0x31e   :  { %v333_v62 = vmul.f32 %v327_v61, %v1956_v15 }
 0x320   :  { %v337_v1 = vadd.f32 1e-05, %v333_v62 }
 0x322   :  { %1669 = vrsqrt.f32 %v337_v1  ;;  %vm365_vm6 = vweird.f32 %v337_v1 }
 0x327   :  { %v330_v5 = vpop.xlane.xlu1 %329 }
 0x328   :  { %v1670_v6 = vpop.eup %1669  ;;  %v334_v7 = vmul.f32 %v330_v5, %v1956_v15 }
 0x329   :  { %v360_v9 = vmul.f32 %v1670_v6, %v337_v1  ;;  %vm366_vm5 = vweird.f32 %v1670_v6 }
 0x32a   :  { %v338_v10 = vadd.f32 1e-05, %v334_v7  ;;  %vm367_vm7 = vmor %vm365_vm6, %vm366_vm5 }
 0x32b   :  { %v361_v12 = vmul.f32 %v1670_v6, %v360_v9 }
 0x32c   :  { %1671 = vrsqrt.f32 %v338_v10  ;;  %vm375_vm15 = vweird.f32 %v338_v10 }
 0x32d   :  { %v362_v14 = vmul.f32 0.5, %v361_v12 }
 0x32f   :  { %v363_v17 = vsub.f32 1.5, %v362_v14 }
 0x331   :  { %v364_v20 = vmul.f32 %v1670_v6, %v363_v17  ;;  %v1541_v17 = vld [vmem:[%s2554_s4 + $0x10] sm:$0xff] }
 0x332   :  { %v1672_v21 = vpop.eup %1671 }
 0x333   :  { %v370_v22 = vmul.f32 %v1672_v21, %v338_v10  ;;  %v368_v33 = vsel %vm367_vm7, %v1670_v6, %v364_v20  ;;  %vm376_vm12 = vweird.f32 %v1672_v21  ;;  %v594_v10 = vld [vmem:[%s2553_s6 + $0x10] sm:$0xff] }
 0x334   :  { %v381_v35 = vmul.f32 %v368_v33, %v313_v43  ;;  %vm377_vm4 = vmor %vm375_vm15, %vm376_vm12  ;;  %v348_v43 = vsel %vm347_vm14, %v1668_v3, %v344_v46  ;;  %v600_v33 = vld [vmem:[%s2555_s5] sm:$0xff] }
 0x335   :  { %v371_v40 = vmul.f32 %v1672_v21, %v370_v22  ;;  %v379_v59 = vmul.f32 %v348_v43, %v1959_v18  ;;  %1571 = vmatmul.msk.f32.vlgmr.msrb.gmra.mxu2 %vm155_vm3, %v600_v33  ;;  %v603_v43 = vld [vmem:[%s2555_s5 + $0x18] sm:$0xff] }
 0x336   :  { %v405_v41 = vmul.f32 %v396_v30, %v381_v35  ;;  %v495_v30 = vld [vmem:[%s2554_s4] sm:$0xff] }
 0x337   :  { %v372_v42 = vmul.f32 0.5, %v371_v40  ;;  %v403_v0 = vmul.f32 %v1998_v56, %v379_v59  ;;  %v1559_v35 = vld [vmem:[%s2555_s5 + $0x20] sm:$0xff]  ;;  %v601_v40 = vld [vmem:[%s2555_s5 + $0x8] sm:$0xff] }
 0x338   :  { %v429_v45 = vadd.f32 %v420_v63, %v405_v41  ;;  %v410_v63 = vpop.permute.xlu2 %409  ;;  %1563 = vmatmul.msk.f32.vlgmr.msrb.gmra.mxu1 %vm155_vm3, %v1559_v35  ;;  %v1560_v41 = vld [vmem:[%s2555_s5 + $0x28] sm:$0xff] }
 0x339   :  { %v373_v48 = vsub.f32 1.5, %v372_v42  ;;  %v427_v2 = vadd.f32 %v410_v63, %v403_v0  ;;  %v602_v42 = vld [vmem:[%s2555_s5 + $0x10] sm:$0xff] }
 0x33a   :  { %v433_v49 = vmax.f32 %v429_v45, 0.0 }
 0x33b   :  { %v374_v51 = vmul.f32 %v1672_v21, %v373_v48  ;;  %v1561_v48 = vld [vmem:[%s2555_s5 + $0x30] sm:$0xff] }
 0x33c   :  { %441 = vrot.lane.b32.xlu1 %v433_v49, %s1689_s17 }
 0x33d   :  { %v378_v53 = vsel %vm377_vm4, %v1672_v21, %v374_v51  ;;  %1572 = vmatmul.msk.f32.gmra.mxu2 %vm155_vm3, %v601_v40 }
 0x33e   :  { %v382_v54 = vmul.f32 %v378_v53, %v1984_v47  ;;  %v431_v47 = vmax.f32 %v427_v2, 0.0  ;;  %v1562_v53 = vld [vmem:[%s2555_s5 + $0x38] sm:$0xff] }
 0x33f   :  { %v415_v58 = vpop.permute.xlu1 %414 }
 0x340   :  { %v428_v61 = vadd.f32 %v415_v58, %v404_v55  ;;  %v406_v60 = vmul.f32 %v1976_v37, %v382_v54  ;;  %1564 = vmatmul.msk.f32.gmra.mxu1 %vm155_vm3, %v1560_v41  ;;  %v1575_v54 = vld [vmem:[%s2555_s5 + $0x40] sm:$0xff]  ;;  %v1576_v55 = vld [vmem:[%s2555_s5 + $0x48] sm:$0xff] }
 0x342   :  { %v432_v62 = vmax.f32 %v428_v61, 0.0  ;;  %v430_v27 = vadd.f32 %v2000_v57, %v406_v60 }
 0x344   :  { %438 = vrot.lane.b32.xlu2 %v432_v62, %s1689_s17  ;;  %v434_v1 = vmax.f32 %v430_v27, 0.0 }
 0x345   :  { %1573 = vmatmul.msk.f32.gmra.mxu2 %vm155_vm3, %v602_v42 }
 0x346   :  { %444 = vrot.lane.b32.xlu0 %v434_v1, %s1689_s17  ;;  %518 = vmatpush.msra.mxu3 %v434_v1 }
 0x348   :  { %519 = vmatpush.msra.mxu3 %v433_v49  ;;  %1565 = vmatmul.msk.f32.gmra.mxu1 %vm155_vm3, %v1561_v48 }
 0x34a   :  { %520 = vmatpush.msra.mxu3 %v432_v62 }
 0x34c   :  { %521 = vmatpush.msra.mxu3 %v431_v47 }
 0x34d   :  { %1543 = vmatmul.msk.f32.vlgmr.msra.gmra.mxu3 %vm155_vm3, %v1541_v17  ;;  %1574 = vmatmul.msk.f32.gmra.mxu2 %vm155_vm3, %v603_v43 }
 0x34e   :  { %435 = vrot.lane.b32.xlu0 %v431_v47, %s1689_s17 }
 0x350   :  { %1566 = vmatmul.msk.f32.gmra.mxu1 %vm155_vm3, %v1562_v53 }
 0x355   :  { %1544 = vmatmul.msk.f32.gmra.mxu3 %vm155_vm3, %v1542_v19  ;;  %v593_v19 = vld [vmem:[%s2553_s6 + $0x8] sm:$0xff] }
 0x39e   :  { %v439_v18 = vpop.permute.xlu2 %438 }
 0x39f   :  { %v440_v37 = vsel %vm73_vm0, %v439_v18, %v432_v62 }
 0x3a0   :  { %449 = vrot.lane.b32.xlu0 %v440_v37, %s1689_s17 }
 0x3ae   :  { %v442_v52 = vpop.permute.xlu1 %441 }
 0x3af   :  { %v443_v56 = vsel %vm73_vm0, %v442_v52, %v433_v49 }
 0x3b0   :  { %451 = vrot.lane.b32.xlu2 %v443_v56, %s1689_s17 }
 0x3b8   :  { %v445_v57 = vpop.permute.xlu0 %444  ;;  %v679_v27 = vpop.f32.mrf.mxu2 }
 0x3b9   :  { %v446_v3 = vsel %vm73_vm0, %v445_v57, %v434_v1 }
 0x3ba   :  { %453 = vrot.lane.b32.xlu1 %v446_v3, %s1689_s17 }
 0x3c0   :  { %v436_v4 = vpop.permute.xlu0 %435 }
 0x3c1   :  { %v437_v5 = vsel %vm73_vm0, %v436_v4, %v431_v47 }
 0x3c2   :  { %447 = vrot.lane.b32.xlu1 %v437_v5, %s1689_s17 }
 0x40a   :  { %v452_v6 = vpop.permute.xlu2 %451 }
 0x40b   :  { %v457_v7 = vsel %vm73_vm0, %v452_v6, %v433_v49  ;;  %v1551_v49 = vld [vmem:[%s2554_s4 + $0x20] sm:$0xff] }
 0x40c   :  { %467 = vrot.lane.b32.xlu0 %v457_v7, %s1691_s22 }
 0x412   :  { %v450_v8 = vpop.permute.xlu0 %449 }
 0x413   :  { %v456_v9 = vsel %vm73_vm0, %v450_v8, %v432_v62  ;;  %v638_v62 = vpop.f32.mrf.mxu1 }
 0x414   :  { %465 = vrot.lane.b32.xlu1 %v456_v9, %s1691_s22 }
 0x41b   :  { %v641_v2 = vpop.f32.mrf.mxu1 }
 0x41c   :  { %483 = vrot.lane.b32.xlu1 %v457_v7, %s1690_s0 }
 0x423   :  { %v644_v57 = vpop.f32.mrf.mxu1 }
 0x424   :  { %841 = vperm.xlu1 %1662, %v594_v10  }
 0x42b   :  { %v647_v10 = vpop.f32.mrf.mxu1 }
 0x42c   :  { %v454_v11 = vpop.permute.xlu1 %453 }
 0x42d   :  { %v458_v12 = vsel %vm73_vm0, %v454_v11, %v434_v1  ;;  %v680_v1 = vadd.f32 %v679_v27, %v638_v62 }
 0x42e   :  { %485 = vrot.lane.b32.xlu0 %v458_v12, %s1690_s0  ;;  %469 = vrot.lane.b32.xlu2 %v458_v12, %s1691_s22 }
 0x434   :  { %v448_v13 = vpop.permute.xlu1 %447 }
 0x435   :  { %v455_v14 = vsel %vm73_vm0, %v448_v13, %v431_v47  ;;  %v682_v47 = vpop.f32.mrf.mxu2 }
 0x436   :  { %479 = vrot.lane.b32.xlu0 %v455_v14, %s1690_s0  ;;  %463 = vrot.lane.b32.xlu2 %v455_v14, %s1691_s22  ;;  %v683_v56 = vadd.f32 %v682_v47, %v641_v2 }
 0x43d   :  { %v685_v4 = vpop.f32.mrf.mxu2 }
 0x43e   :  { %846 = vperm.xlu0 %1661, %v595_v16   ;;  %481 = vrot.lane.b32.xlu2 %v456_v9, %s1690_s0  ;;  %v686_v7 = vadd.f32 %v685_v4, %v644_v57 }
 0x445   :  { %v688_v11 = vpop.f32.mrf.mxu2 }
 0x446   :  { %v689_v13 = vadd.f32 %v688_v11, %v647_v10 }
 0x47e   :  { %v468_v21 = vpop.permute.xlu0 %467 }
 0x486   :  { %v466_v22 = vpop.permute.xlu1 %465 }
 0x488   :  { %v470_v20 = vpop.permute.xlu2 %469 }
 0x489   :  { %1545 = vmatpush.msk.msrb.mxu3 %vm62_vm2, %v470_v20  ;;  %v599_v20 = vld [vmem:[%s2556_s7 + $0x18] sm:$0xff] }
 0x48b   :  { %1546 = vmatpush.msk.msrb.mxu3 %vm62_vm2, %v468_v21  ;;  %v598_v21 = vld [vmem:[%s2556_s7 + $0x10] sm:$0xff] }
 0x48d   :  { %1547 = vmatpush.msk.msrb.mxu3 %vm62_vm2, %v466_v22 }
 0x48e   :  { %v484_v45 = vpop.permute.xlu1 %483 }
 0x490   :  { %v464_v34 = vpop.permute.xlu2 %463 }
 0x491   :  { %1548 = vmatpush.msk.msrb.mxu3 %vm62_vm2, %v464_v34 }
 0x492   :  { %1549 = vmatmul.msk.f32.vlgmr.msrb.gmra.mxu3 %vm155_vm3, %v495_v30 }
 0x496   :  { %v2179_v22 = vpop.permute.xlu1 %841 }
 0x498   :  { %v482_v46 = vpop.permute.xlu2 %481 }
 0x49a   :  { %1550 = vmatmul.msk.f32.gmra.mxu3 %vm155_vm3, %v496_v39 }
 0x4a0   :  { %v486_v44 = vpop.permute.xlu0 %485 }
 0x4a1   :  { %1553 = vmatpush.msk.msrb.mxu0 %vm67_vm1, %v486_v44  ;;  %1651 = vmatpush.msk.msra.mxu3 %vm67_vm1, %v486_v44 }
 0x4a3   :  { %1554 = vmatpush.msk.msrb.mxu0 %vm67_vm1, %v484_v45  ;;  %1652 = vmatpush.msk.msra.mxu3 %vm67_vm1, %v484_v45 }
 0x4a5   :  { %1555 = vmatpush.msk.msrb.mxu0 %vm67_vm1, %v482_v46  ;;  %1653 = vmatpush.msk.msra.mxu3 %vm67_vm1, %v482_v46 }
 0x4a8   :  { %v480_v51 = vpop.permute.xlu0 %479 }
 0x4a9   :  { %1556 = vmatpush.msk.msrb.mxu0 %vm67_vm1, %v480_v51  ;;  %1654 = vmatpush.msk.msra.mxu3 %vm67_vm1, %v480_v51 }
 0x4aa   :  { %1557 = vmatmul.msk.f32.vlgmr.msrb.gmra.mxu0 %vm155_vm3, %v1551_v49  ;;  %1558 = vmatmul.msk.f32.vlgmr.msra.gmra.mxu3 %vm155_vm3, %v1552_v50 }
 0x4ab   :  { %1579 = vmatpush.msk.msrb.mxu3 %vm67_vm1, %v1832_v24 }
 0x4ad   :  { %1580 = vmatpush.msk.msrb.mxu3 %vm67_vm1, %v1851_v29 }
 0x4af   :  { %1581 = vmatpush.msk.msrb.mxu3 %vm67_vm1, %v1849_v28 }
 0x4b0   :  { %v2181_v30 = vpop.permute.xlu0 %846 }
 0x4b1   :  { %1582 = vmatpush.msk.msrb.mxu3 %vm67_vm1, %v1889_v38 }
 0x4b2   :  { %1583 = vmatmul.msk.f32.vlgmr.msrb.gmra.mxu3 %vm155_vm3, %v1575_v54 }
 0x4b3   :  { %1613 = vmatpush.msk.msra.mxu3 %vm62_vm2, %v1840_v26  ;;  %v1577_v26 = vld [vmem:[%s2555_s5 + $0x50] sm:$0xff] }
 0x4b5   :  { %1614 = vmatpush.msk.msra.mxu3 %vm62_vm2, %v1863_v31  ;;  %v1578_v31 = vld [vmem:[%s2555_s5 + $0x58] sm:$0xff] }
 0x4b7   :  { %1615 = vmatpush.msk.msra.mxu3 %vm62_vm2, %v1868_v32  ;;  %v523_v32 = vpop.f32.mrf.mxu3 }
 0x4b9   :  { %1616 = vmatpush.msk.msra.mxu3 %vm62_vm2, %v1884_v36 }
 0x4ba   :  { %1584 = vmatmul.msk.f32.gmra.mxu3 %vm155_vm3, %v1576_v55 }
 0x4bf   :  { %v526_v36 = vpop.f32.mrf.mxu3 }
 0x4c2   :  { %1585 = vmatmul.msk.f32.gmra.mxu3 %vm155_vm3, %v1577_v26 }
 0x4ca   :  { %1586 = vmatmul.msk.f32.gmra.mxu3 %vm155_vm3, %v1578_v31 }
 0x515   :  { %v552_v58 = vpop.f32.mrf.mxu3 }
 0x516   :  { %v2162_v59 = vadd.f32 %v552_v58, %v523_v32  ;;  %v596_v32 = vld [vmem:[%s2556_s7] sm:$0xff]  ;;  %v597_v58 = vld [vmem:[%s2556_s7 + $0x8] sm:$0xff] }
 0x51d   :  { %v555_v61 = vpop.f32.mrf.mxu3 }
 0x51e   :  { %v556_v60 = vadd.f32 %v555_v61, %v526_v36  ;;  %v592_v36 = vld [vmem:[%s2553_s6] sm:$0xff] }
 0x52d   :  { %v587_v63 = vpop.f32.mrf.mxu3 }
 0x52e   :  { %v2164_v0 = vadd.f32 %v587_v63, %v556_v60 }
 0x535   :  { %v725_v18 = vpop.f32.mrf.mxu3 }
 0x536   :  { %v737_v37 = vadd.f32 %v725_v18, %v680_v1 }
 0x538   :  { %v741_v52 = vsel %vm155_vm3, %v737_v37, 0.0 }
 0x539   :  { %742 = vadd.xlane.f32.xlu1 %v741_v52 }
 0x53d   :  { %v728_v3 = vpop.f32.mrf.mxu3 }
 0x53e   :  { %v738_v5 = vadd.f32 %v728_v3, %v683_v56 }
 0x540   :  { %v744_v6 = vsel %vm155_vm3, %v738_v5, 0.0 }
 0x541   :  { %745 = vadd.xlane.f32.xlu0 %v744_v6 }
 0x545   :  { %v731_v8 = vpop.f32.mrf.mxu3 }
 0x546   :  { %v739_v9 = vadd.f32 %v731_v8, %v686_v7 }
 0x548   :  { %v747_v12 = vsel %vm155_vm3, %v739_v9, 0.0 }
 0x549   :  { %748 = vadd.xlane.f32.xlu2 %v747_v12 }
 0x54d   :  { %v734_v14 = vpop.f32.mrf.mxu3 }
 0x54e   :  { %v740_v16 = vadd.f32 %v734_v14, %v689_v13 }
 0x550   :  { %v750_v17 = vsel %vm155_vm3, %v740_v16, 0.0 }
 0x551   :  { %751 = vadd.xlane.f32.xlu1 %v750_v17 }
 0x555   :  { %836 = vperm.xlu0 %1661, %v593_v19  }
 0x561   :  { %870 = vperm.xlu2 %1660, %v599_v20  }
 0x56a   :  { %865 = vperm.xlu1 %1662, %v598_v21  }
 0x5ac   :  { %v743_v33 = vpop.xlane.xlu1 %742 }
 0x5ad   :  { %v753_v34 = vmul.f32 %v743_v33, %v1956_v15 }
 0x5af   :  { %v2184_v35 = vsub.f32 %v737_v37, %v753_v34 }
 0x5b1   :  { %v761_v39 = vmul.f32 %v2184_v35, %v2184_v35 }
 0x5b3   :  { %v765_v40 = vsel %vm155_vm3, %v761_v39, 0.0 }
 0x5b4   :  { %v746_v41 = vpop.xlane.xlu0 %745  ;;  %766 = vadd.xlane.f32.xlu2 %v765_v40 }
 0x5b5   :  { %v754_v42 = vmul.f32 %v746_v41, %v1956_v15 }
 0x5b7   :  { %v758_v44 = vsub.f32 %v738_v5, %v754_v42 }
 0x5b9   :  { %v762_v45 = vmul.f32 %v758_v44, %v758_v44 }
 0x5bb   :  { %v768_v46 = vsel %vm155_vm3, %v762_v45, 0.0 }
 0x5bc   :  { %v749_v48 = vpop.xlane.xlu2 %748  ;;  %769 = vadd.xlane.f32.xlu1 %v768_v46 }
 0x5bd   :  { %v755_v49 = vmul.f32 %v749_v48, %v1956_v15 }
 0x5bf   :  { %v2192_v50 = vsub.f32 %v739_v9, %v755_v49 }
 0x5c1   :  { %v763_v51 = vmul.f32 %v2192_v50, %v2192_v50 }
 0x5c3   :  { %v771_v43 = vsel %vm155_vm3, %v763_v51, 0.0 }
 0x5c4   :  { %772 = vadd.xlane.f32.xlu0 %v771_v43  ;;  %v752_v53 = vpop.xlane.xlu1 %751  ;;  %v2212_v61 = vpop.permute.xlu2 %870 }
 0x5c5   :  { %v756_v54 = vmul.f32 %v752_v53, %v1956_v15 }
 0x5c7   :  { %v2198_v55 = vsub.f32 %v740_v16, %v756_v54  ;;  %v837_v62 = vpop.permute.xlu0 %836 }
 0x5c9   :  { %v764_v26 = vmul.f32 %v2198_v55, %v2198_v55 }
 0x5cb   :  { %v774_v31 = vsel %vm155_vm3, %v764_v26, 0.0 }
 0x5cc   :  { %775 = vadd.xlane.f32.xlu2 %v774_v31 }
 0x5d5   :  { %855 = vperm.xlu1 %1662, %v596_v32  }
 0x5d8   :  { %831 = vperm.xlu0 %1661, %v592_v36  }
 0x5dc   :  { %v866_v60 = vpop.permute.xlu1 %865 }
 0x5e4   :  { %860 = vperm.xlu2 %1660, %v597_v58  }
 0x627   :  { %v767_v27 = vpop.xlane.xlu2 %766 }
 0x628   :  { %v777_v2 = vmul.f32 %v767_v27, %v1956_v15 }
 0x62a   :  { %v781_v18 = vadd.f32 1e-05, %v777_v2 }
 0x62c   :  { %vm791_vm15 = vweird.f32 %v781_v18 }
 0x62f   :  { %v770_v63 = vpop.xlane.xlu1 %769 }
 0x630   :  { %v778_v1 = vmul.f32 %v770_v63, %v1956_v15 }
 0x632   :  { %v782_v47 = vadd.f32 1e-05, %v778_v1 }
 0x634   :  { %1673 = vrsqrt.f32 %v782_v47  ;;  %vm801_vm6 = vweird.f32 %v782_v47 }
 0x635   :  { %1675 = vrsqrt.f32 %v781_v18 }
 0x637   :  { %v773_v37 = vpop.xlane.xlu0 %772 }
 0x638   :  { %v779_v52 = vmul.f32 %v773_v37, %v1956_v15 }
 0x63a   :  { %v1674_v56 = vpop.eup %1673  ;;  %v783_v57 = vadd.f32 1e-05, %v779_v52 }
 0x63b   :  { %v796_v3 = vmul.f32 %v1674_v56, %v782_v47  ;;  %v1676_v7 = vpop.eup %1675  ;;  %vm802_vm5 = vweird.f32 %v1674_v56 }
 0x63c   :  { %1677 = vrsqrt.f32 %v783_v57  ;;  %v786_v12 = vmul.f32 %v1676_v7, %v781_v18  ;;  %vm803_vm7 = vmor %vm801_vm6, %vm802_vm5  ;;  %vm811_vm9 = vweird.f32 %v783_v57  ;;  %vm792_vm13 = vweird.f32 %v1676_v7 }
 0x63d   :  { %v797_v4 = vmul.f32 %v1674_v56, %v796_v3  ;;  %vm793_vm4 = vmor %vm791_vm15, %vm792_vm13 }
 0x63e   :  { %v787_v20 = vmul.f32 %v1676_v7, %v786_v12 }
 0x63f   :  { %v798_v5 = vmul.f32 0.5, %v797_v4  ;;  %v776_v6 = vpop.xlane.xlu2 %775 }
 0x640   :  { %v780_v8 = vmul.f32 %v776_v6, %v1956_v15  ;;  %v788_v42 = vmul.f32 0.5, %v787_v20  ;;  %v1050_v20 = vld [vmem:[%s2558_s9] sm:$0xff] }
 0x641   :  { %v799_v9 = vsub.f32 1.5, %v798_v5  ;;  %1617 = vmatmul.msk.f32.vlgmr.msra.gmra.mxu3 %vm155_vm3, %v1050_v20 }
 0x642   :  { %v1678_v10 = vpop.eup %1677  ;;  %v784_v11 = vadd.f32 1e-05, %v780_v8 }
 0x643   :  { %v806_v13 = vmul.f32 %v1678_v10, %v783_v57  ;;  %v800_v14 = vmul.f32 %v1674_v56, %v799_v9  ;;  %vm812_vm8 = vweird.f32 %v1678_v10 }
 0x644   :  { %1679 = vrsqrt.f32 %v784_v11  ;;  %vm813_vm10 = vmor %vm811_vm9, %vm812_vm8  ;;  %vm821_vm12 = vweird.f32 %v784_v11 }
 0x645   :  { %v807_v16 = vmul.f32 %v1678_v10, %v806_v13  ;;  %v804_v17 = vsel %vm803_vm7, %v1674_v56, %v800_v14  ;;  %v1045_v14 = vld [vmem:[%s2557_s10 + $0x18] sm:$0xff] }
 0x646   :  { %v826_v19 = vmul.f32 %v804_v17, %v758_v44  ;;  %v789_v44 = vsub.f32 1.5, %v788_v42  ;;  %v1607_v42 = vld [vmem:[%s2558_s9 + $0x30] sm:$0xff] }
 0x647   :  { %v808_v21 = vmul.f32 0.5, %v807_v16  ;;  %v861_v39 = vpop.permute.xlu2 %860  ;;  %v856_v18 = vpop.permute.xlu1 %855 }
 0x648   :  { %v850_v33 = vmul.f32 %v837_v62, %v826_v19  ;;  %v790_v36 = vmul.f32 %v1676_v7, %v789_v44  ;;  %v1605_v19 = vld [vmem:[%s2558_s9 + $0x20] sm:$0xff] }
 0x649   :  { %v809_v34 = vsub.f32 1.5, %v808_v21  ;;  %1609 = vmatmul.msk.f32.vlgmr.msra.gmra.mxu2 %vm155_vm3, %v1605_v19 }
 0x64a   :  { %v1680_v40 = vpop.eup %1679  ;;  %v874_v41 = vadd.f32 %v861_v39, %v850_v33  ;;  %v794_v27 = vsel %vm793_vm4, %v1676_v7, %v790_v36  ;;  %v832_v63 = vpop.permute.xlu0 %831  ;;  %v1044_v7 = vld [vmem:[%s2557_s10 + $0x10] sm:$0xff]  ;;  %v941_v33 = vld [vmem:[%s2559_s8] sm:$0xff]  ;;  %v1606_v39 = vld [vmem:[%s2558_s9 + $0x28] sm:$0xff] }
 0x64b   :  { %v810_v45 = vmul.f32 %v1678_v10, %v809_v34  ;;  %v816_v46 = vmul.f32 %v1680_v40, %v784_v11  ;;  %vm822_vm11 = vweird.f32 %v1680_v40 }
 0x64c   :  { %v2218_v48 = vmax.f32 %v874_v41, 0.0  ;;  %vm823_vm14 = vmor %vm821_vm12, %vm822_vm11  ;;  %v942_v41 = vld [vmem:[%s2559_s8 + $0x8] sm:$0x1] }
 0x64d   :  { %v814_v49 = vsel %vm813_vm10, %v1678_v10, %v810_v45  ;;  %v817_v51 = vmul.f32 %v1680_v40, %v816_v46  ;;  %v1052_v45 = vld [vmem:[%s2558_s9 + $0x10] sm:$0xff]  ;;  %v1608_v46 = vld [vmem:[%s2558_s9 + $0x38] sm:$0xff] }
 0x64e   :  { %v827_v43 = vmul.f32 %v814_v49, %v2192_v50  ;;  %884 = vrot.lane.b32.xlu1 %v2218_v48, %s1689_s17  ;;  %v1623_v49 = vld [vmem:[%s2558_s9 + $0x50] sm:$0xff] }
 0x64f   :  { %v818_v53 = vmul.f32 0.5, %v817_v51  ;;  %v1624_v51 = vld [vmem:[%s2558_s9 + $0x58] sm:$0xff] }
 0x650   :  { %v851_v54 = vmul.f32 %v2179_v22, %v827_v43  ;;  %v584_v43 = vpop.f32.mrf.mxu0 }
 0x651   :  { %v819_v26 = vsub.f32 1.5, %v818_v53  ;;  %1610 = vmatmul.msk.f32.gmra.mxu2 %vm155_vm3, %v1606_v39  ;;  %v590_v44 = vadd.f32 %v584_v43, %v2162_v59 }
 0x652   :  { %v875_v31 = vadd.f32 %v866_v60, %v851_v54  ;;  %v825_v60 = vmul.f32 %v794_v27, %v2184_v35 }
 0x653   :  { %v820_v32 = vmul.f32 %v1680_v40, %v819_v26 }
 0x654   :  { %v2224_v58 = vmax.f32 %v875_v31, 0.0  ;;  %v849_v2 = vmul.f32 %v832_v63, %v825_v60 }
 0x655   :  { %v824_v62 = vsel %vm823_vm14, %v1680_v40, %v820_v32  ;;  %v1051_v40 = vld [vmem:[%s2558_s9 + $0x8] sm:$0xff] }
 0x656   :  { %v828_v50 = vmul.f32 %v824_v62, %v2198_v55  ;;  %887 = vrot.lane.b32.xlu2 %v2224_v58, %s1689_s17  ;;  %v873_v37 = vadd.f32 %v856_v18, %v849_v2  ;;  %1618 = vmatmul.msk.f32.gmra.mxu3 %vm155_vm3, %v1051_v40 }
 0x658   :  { %v852_v22 = vmul.f32 %v2181_v30, %v828_v50  ;;  %v877_v52 = vmax.f32 %v873_v37, 0.0 }
 0x659   :  { %1611 = vmatmul.msk.f32.gmra.mxu2 %vm155_vm3, %v1607_v42 }
 0x65a   :  { %v876_v1 = vadd.f32 %v2212_v61, %v852_v22 }
 0x65c   :  { %v880_v47 = vmax.f32 %v876_v1, 0.0 }
 0x65e   :  { %890 = vrot.lane.b32.xlu0 %v880_v47, %s1689_s17  ;;  %1619 = vmatmul.msk.f32.gmra.mxu3 %vm155_vm3, %v1052_v45 }
 0x661   :  { %1612 = vmatmul.msk.f32.gmra.mxu2 %vm155_vm3, %v1608_v46 }
 0x666   :  { %881 = vrot.lane.b32.xlu0 %v877_v52, %s1689_s17 }
 0x6b0   :  { %v888_v55 = vpop.permute.xlu2 %887 }
 0x6b1   :  { %v889_v56 = vsel %vm73_vm0, %v888_v55, %v2224_v58 }
 0x6b2   :  { %897 = vrot.lane.b32.xlu1 %v889_v56, %s1689_s17 }
 0x6c0   :  { %v885_v30 = vpop.permute.xlu1 %884 }
 0x6c1   :  { %v886_v35 = vsel %vm73_vm0, %v885_v30, %v2218_v48 }
 0x6c2   :  { %895 = vrot.lane.b32.xlu0 %v886_v35, %s1689_s17 }
 0x6c4   :  { %v1129_v62 = vpop.f32.mrf.mxu3 }
 0x6d0   :  { %v891_v61 = vpop.permute.xlu0 %890 }
 0x6d1   :  { %v892_v57 = vsel %vm73_vm0, %v891_v61, %v880_v47 }
 0x6d2   :  { %899 = vrot.lane.b32.xlu2 %v892_v57, %s1689_s17 }
 0x6d8   :  { %v882_v3 = vpop.permute.xlu0 %881 }
 0x6d9   :  { %v883_v4 = vsel %vm73_vm0, %v882_v3, %v877_v52  ;;  %v1132_v60 = vpop.f32.mrf.mxu3 }
 0x6da   :  { %893 = vrot.lane.b32.xlu2 %v883_v4, %s1689_s17 }
 0x724   :  { %v898_v5 = vpop.permute.xlu1 %897 }
 0x725   :  { %v2246_v6 = vsel %vm73_vm0, %v898_v5, %v2224_v58 }
 0x726   :  { %913 = vrot.lane.b32.xlu0 %v2246_v6, %s1691_s22 }
 0x72c   :  { %v900_v8 = vpop.permute.xlu2 %899 }
 0x72d   :  { %v2254_v9 = vsel %vm73_vm0, %v900_v8, %v880_v47 }
 0x72e   :  { %915 = vrot.lane.b32.xlu1 %v2254_v9, %s1691_s22  ;;  %1291 = vperm.xlu0 %1661, %v1044_v7  }
 0x734   :  { %v894_v10 = vpop.permute.xlu2 %893  ;;  %v896_v11 = vpop.permute.xlu0 %895 }
 0x735   :  { %v2259_v12 = vsel %vm73_vm0, %v894_v10, %v877_v52  ;;  %v2263_v13 = vsel %vm73_vm0, %v896_v11, %v2218_v48  ;;  %v1048_v10 = vld [vmem:[%s2560_s11 + $0x10] sm:$0xff]  ;;  %v1049_v11 = vld [vmem:[%s2560_s11 + $0x18] sm:$0xff] }
 0x736   :  { %909 = vrot.lane.b32.xlu1 %v2259_v12, %s1691_s22  ;;  %911 = vrot.lane.b32.xlu2 %v2263_v13, %s1691_s22 }
 0x73e   :  { %1296 = vperm.xlu1 %1662, %v1045_v14   ;;  %v1043_v14 = vld [vmem:[%s2557_s10 + $0x8] sm:$0xff] }
 0x790   :  { %v912_v21 = vpop.permute.xlu2 %911 }
 0x798   :  { %v914_v17 = vpop.permute.xlu0 %913 }
 0x7a0   :  { %v916_v16 = vpop.permute.xlu1 %915 }
 0x7a1   :  { %1587 = vmatpush.msk.msra.mxu0 %vm62_vm2, %v916_v16  ;;  %v2377_v16 = vpop.permute.xlu0 %1291 }
 0x7a3   :  { %1588 = vmatpush.msk.msra.mxu0 %vm62_vm2, %v914_v17 }
 0x7a5   :  { %1589 = vmatpush.msk.msra.mxu0 %vm62_vm2, %v912_v21 }
 0x7a8   :  { %v910_v34 = vpop.permute.xlu1 %909 }
 0x7a9   :  { %1590 = vmatpush.msk.msra.mxu0 %vm62_vm2, %v910_v34 }
 0x7aa   :  { %1591 = vmatmul.msk.f32.vlgmr.msra.gmra.mxu0 %vm155_vm3, %v941_v33 }
 0x7ab   :  { %995 = vmatpush.msrb.mxu0 %v880_v47 }
 0x7ad   :  { %996 = vmatpush.msrb.mxu0 %v2224_v58  ;;  %v1088_v58 = vpop.f32.mrf.mxu2 }
 0x7ae   :  { %v1130_v22 = vadd.f32 %v1129_v62, %v1088_v58 }
 0x7af   :  { %997 = vmatpush.msrb.mxu0 %v2218_v48  ;;  %v1622_v48 = vld [vmem:[%s2558_s9 + $0x48] sm:$0xff] }
 0x7b0   :  { %v2379_v17 = vpop.permute.xlu1 %1296 }
 0x7b1   :  { %998 = vmatpush.msrb.mxu0 %v877_v52 }
 0x7b2   :  { %1592 = vmatmul.msk.f32.gmra.mxu0 %vm155_vm3, %v942_v41 }
 0x7b3   :  { %1625 = vmatpush.msk.msra.mxu0 %vm67_vm1, %v1832_v24  ;;  %v1593_v24 = vld [vmem:[%s2559_s8 + $0x10] sm:$0xff] }
 0x7b5   :  { %1626 = vmatpush.msk.msra.mxu0 %vm67_vm1, %v1851_v29  ;;  %v1053_v29 = vld [vmem:[%s2558_s9 + $0x18] sm:$0xff]  ;;  %v1091_v63 = vpop.f32.mrf.mxu2 }
 0x7b6   :  { %1620 = vmatmul.msk.f32.gmra.mxu3 %vm155_vm3, %v1053_v29  ;;  %v1133_v47 = vadd.f32 %v1132_v60, %v1091_v63 }
 0x7b7   :  { %1627 = vmatpush.msk.msra.mxu0 %vm67_vm1, %v1849_v28  ;;  %v1594_v28 = vld [vmem:[%s2559_s8 + $0x18] sm:$0x1] }
 0x7b9   :  { %1628 = vmatpush.msk.msra.mxu0 %vm67_vm1, %v1889_v38  ;;  %v1621_v38 = vld [vmem:[%s2558_s9 + $0x40] sm:$0xff] }
 0x7ba   :  { %1595 = vmatmul.msk.f32.vlgmr.msrb.gmra.mxu0 %vm155_vm3, %v1593_v24 }
 0x7bd   :  { %v1094_v18 = vpop.f32.mrf.mxu2 }
 0x7c2   :  { %1596 = vmatmul.msk.f32.gmra.mxu0 %vm155_vm3, %v1594_v28 }
 0x7c5   :  { %v1097_v61 = vpop.f32.mrf.mxu2 }
 0x7ca   :  { %1629 = vmatmul.msk.f32.vlgmr.msra.gmra.mxu0 %vm155_vm3, %v1621_v38 }
 0x7d2   :  { %1630 = vmatmul.msk.f32.gmra.mxu0 %vm155_vm3, %v1622_v48 }
 0x7da   :  { %1631 = vmatmul.msk.f32.gmra.mxu0 %vm155_vm3, %v1623_v49 }
 0x7e2   :  { %1632 = vmatmul.msk.f32.gmra.mxu0 %vm155_vm3, %v1624_v51 }
 0x827   :  { %v966_v53 = vpop.f32.mrf.mxu0 }
 0x828   :  { %v972_v54 = vadd.f32 %v966_v53, %v590_v44  ;;  %v1047_v53 = vld [vmem:[%s2560_s11 + $0x8] sm:$0xff] }
 0x82f   :  { %v969_v26 = vpop.f32.mrf.mxu0 }
 0x830   :  { %v973_v31 = vadd.f32 %v969_v26, %v2164_v0  ;;  %v1135_v0 = vpop.f32.mrf.mxu3  ;;  %v1042_v26 = vld [vmem:[%s2557_s10] sm:$0xff] }
 0x831   :  { %v1136_v56 = vadd.f32 %v1135_v0, %v1094_v18 }
 0x837   :  { %v1000_v32 = vpop.f32.mrf.mxu0 }
 0x838   :  { %v2360_v36 = vadd.f32 %v1000_v32, %v972_v54  ;;  %v1046_v54 = vld [vmem:[%s2560_s11] sm:$0xff] }
 0x839   :  { %v1138_v57 = vpop.f32.mrf.mxu3 }
 0x83a   :  { %v1139_v4 = vadd.f32 %v1138_v57, %v1097_v61 }
 0x83f   :  { %v1003_v50 = vpop.f32.mrf.mxu0 }
 0x840   :  { %v2362_v27 = vadd.f32 %v1003_v50, %v973_v31 }
 0x847   :  { %v1175_v1 = vpop.f32.mrf.mxu0 }
 0x848   :  { %v1187_v2 = vadd.f32 %v1175_v1, %v1130_v22 }
 0x84a   :  { %v1191_v59 = vsel %vm155_vm3, %v1187_v2, 0.0 }
 0x84b   :  { %1192 = vadd.xlane.f32.xlu0 %v1191_v59 }
 0x84f   :  { %v1178_v37 = vpop.f32.mrf.mxu0 }
 0x850   :  { %v1188_v52 = vadd.f32 %v1178_v37, %v1133_v47 }
 0x852   :  { %v1194_v55 = vsel %vm155_vm3, %v1188_v52, 0.0 }
 0x853   :  { %1195 = vadd.xlane.f32.xlu1 %v1194_v55 }
 0x857   :  { %v1181_v30 = vpop.f32.mrf.mxu0 }
 0x858   :  { %v1189_v35 = vadd.f32 %v1181_v30, %v1136_v56 }
 0x85a   :  { %v1197_v3 = vsel %vm155_vm3, %v1189_v35, 0.0 }
 0x85b   :  { %1198 = vadd.xlane.f32.xlu2 %v1197_v3 }
 0x85f   :  { %v1184_v5 = vpop.f32.mrf.mxu0 }
 0x860   :  { %v1190_v7 = vadd.f32 %v1184_v5, %v1139_v4 }
 0x862   :  { %v1200_v8 = vsel %vm155_vm3, %v1190_v7, 0.0 }
 0x863   :  { %1201 = vadd.xlane.f32.xlu0 %v1200_v8 }
 0x86c   :  { %1315 = vperm.xlu1 %1662, %v1048_v10  }
 0x873   :  { %1320 = vperm.xlu2 %1660, %v1049_v11  }
 0x877   :  { %1286 = vperm.xlu0 %1661, %v1043_v14  }
 0x8be   :  { %v1193_v19 = vpop.xlane.xlu0 %1192 }
 0x8bf   :  { %v1203_v20 = vmul.f32 %v1193_v19, %v1956_v15 }
 0x8c1   :  { %v2382_v21 = vsub.f32 %v1187_v2, %v1203_v20 }
 0x8c3   :  { %v1211_v33 = vmul.f32 %v2382_v21, %v2382_v21 }
 0x8c5   :  { %v1215_v34 = vsel %vm155_vm3, %v1211_v33, 0.0 }
 0x8c6   :  { %1216 = vadd.xlane.f32.xlu2 %v1215_v34  ;;  %v1196_v39 = vpop.xlane.xlu1 %1195 }
 0x8c7   :  { %v1204_v40 = vmul.f32 %v1196_v39, %v1956_v15 }
 0x8c9   :  { %v1208_v41 = vsub.f32 %v1188_v52, %v1204_v40 }
 0x8cb   :  { %v1212_v42 = vmul.f32 %v1208_v41, %v1208_v41 }
 0x8cd   :  { %v1218_v45 = vsel %vm155_vm3, %v1212_v42, 0.0 }
 0x8ce   :  { %v1199_v24 = vpop.xlane.xlu2 %1198  ;;  %1219 = vadd.xlane.f32.xlu0 %v1218_v45 }
 0x8cf   :  { %v1205_v46 = vmul.f32 %v1199_v24, %v1956_v15 }
 0x8d1   :  { %v2390_v29 = vsub.f32 %v1189_v35, %v1205_v46 }
 0x8d3   :  { %v1213_v28 = vmul.f32 %v2390_v29, %v2390_v29 }
 0x8d5   :  { %v1221_v38 = vsel %vm155_vm3, %v1213_v28, 0.0 }
 0x8d6   :  { %1222 = vadd.xlane.f32.xlu1 %v1221_v38  ;;  %v1202_v48 = vpop.xlane.xlu0 %1201  ;;  %v2410_v32 = vpop.permute.xlu2 %1320 }
 0x8d7   :  { %v1206_v49 = vmul.f32 %v1202_v48, %v1956_v15 }
 0x8d9   :  { %v2396_v51 = vsub.f32 %v1190_v7, %v1206_v49 }
 0x8db   :  { %v1214_v43 = vmul.f32 %v2396_v51, %v2396_v51 }
 0x8dd   :  { %v1224_v44 = vsel %vm155_vm3, %v1214_v43, 0.0 }
 0x8de   :  { %1225 = vadd.xlane.f32.xlu2 %v1224_v44  ;;  %v1316_v58 = vpop.permute.xlu1 %1315 }
 0x8e2   :  { %1310 = vperm.xlu0 %1661, %v1047_v53  }
 0x8e9   :  { %v1287_v31 = vpop.permute.xlu0 %1286 }
 0x8ef   :  { %1305 = vperm.xlu1 %1662, %v1046_v54  }
 0x8f6   :  { %1281 = vperm.xlu2 %1660, %v1042_v26  }
 0x939   :  { %v1217_v50 = vpop.xlane.xlu2 %1216 }
 0x93a   :  { %v1227_v60 = vmul.f32 %v1217_v50, %v1956_v15 }
 0x93c   :  { %v1231_v1 = vadd.f32 1e-05, %v1227_v60 }
 0x93e   :  { %vm1241_vm15 = vweird.f32 %v1231_v1 }
 0x941   :  { %v1220_v62 = vpop.xlane.xlu0 %1219 }
 0x942   :  { %v1228_v22 = vmul.f32 %v1220_v62, %v1956_v15 }
 0x944   :  { %v1232_v63 = vadd.f32 1e-05, %v1228_v22 }
 0x946   :  { %1681 = vrsqrt.f32 %v1232_v63  ;;  %vm1251_vm6 = vweird.f32 %v1232_v63 }
 0x947   :  { %1683 = vrsqrt.f32 %v1231_v1 }
 0x949   :  { %v1223_v2 = vpop.xlane.xlu1 %1222 }
 0x94a   :  { %v1229_v59 = vmul.f32 %v1223_v2, %v1956_v15 }
 0x94c   :  { %v1682_v47 = vpop.eup %1681  ;;  %v1233_v18 = vadd.f32 1e-05, %v1229_v59 }
 0x94d   :  { %v1246_v37 = vmul.f32 %v1682_v47, %v1232_v63  ;;  %v1684_v30 = vpop.eup %1683  ;;  %vm1252_vm5 = vweird.f32 %v1682_v47 }
 0x94e   :  { %1685 = vrsqrt.f32 %v1233_v18  ;;  %vm1253_vm7 = vmor %vm1251_vm6, %vm1252_vm5  ;;  %v1236_v5 = vmul.f32 %v1684_v30, %v1231_v1  ;;  %vm1261_vm9 = vweird.f32 %v1233_v18  ;;  %vm1242_vm14 = vweird.f32 %v1684_v30 }
 0x94f   :  { %v1247_v0 = vmul.f32 %v1682_v47, %v1246_v37  ;;  %vm1243_vm4 = vmor %vm1241_vm15, %vm1242_vm14 }
 0x950   :  { %v1237_v19 = vmul.f32 %v1684_v30, %v1236_v5 }
 0x951   :  { %v1248_v52 = vmul.f32 0.5, %v1247_v0  ;;  %v1226_v55 = vpop.xlane.xlu2 %1225 }
 0x952   :  { %v1230_v56 = vmul.f32 %v1226_v55, %v1956_v15  ;;  %v1238_v45 = vmul.f32 0.5, %v1237_v19  ;;  %v1391_v19 = vld [vmem:[%s2562_s12] sm:$0xff] }
 0x953   :  { %v1249_v35 = vsub.f32 1.5, %v1248_v52 }
 0x954   :  { %v1686_v61 = vpop.eup %1685  ;;  %v1234_v57 = vadd.f32 1e-05, %v1230_v56  ;;  %v1311_v15 = vpop.permute.xlu0 %1310  ;;  %v1239_v48 = vsub.f32 1.5, %v1238_v45  ;;  %v1640_v45 = vld [vmem:[%s2562_s12 + $0x18] sm:$0x1] }
 0x955   :  { %v1256_v3 = vmul.f32 %v1686_v61, %v1233_v18  ;;  %v1250_v4 = vmul.f32 %v1682_v47, %v1249_v35  ;;  %vm1262_vm8 = vweird.f32 %v1686_v61  ;;  %v1492_v35 = vld [vmem:[%s2561_s13] sm:$0xff] }
 0x956   :  { %1687 = vrsqrt.f32 %v1234_v57  ;;  %vm1263_vm10 = vmor %vm1261_vm9, %vm1262_vm8  ;;  %vm1271_vm12 = vweird.f32 %v1234_v57  ;;  %v1240_v26 = vmul.f32 %v1684_v30, %v1239_v48 }
 0x957   :  { %v1257_v7 = vmul.f32 %v1686_v61, %v1256_v3  ;;  %v1254_v8 = vsel %vm1253_vm7, %v1682_v47, %v1250_v4  ;;  %v1597_v4 = vld [vmem:[%s2559_s8 + $0x20] sm:$0xff] }
 0x958   :  { %v1276_v10 = vmul.f32 %v1254_v8, %v1208_v41 }
 0x959   :  { %v1258_v11 = vmul.f32 0.5, %v1257_v7  ;;  %v1282_v62 = vpop.permute.xlu2 %1281  ;;  %v1598_v7 = vld [vmem:[%s2559_s8 + $0x28] sm:$0x1] }
 0x95a   :  { %v1300_v14 = vmul.f32 %v1287_v31, %v1276_v10  ;;  %v1244_v31 = vsel %vm1243_vm4, %v1684_v30, %v1240_v26  ;;  %v1493_v30 = vld [vmem:[%s2561_s13 + $0x8] sm:$0x1] }
 0x95b   :  { %v1259_v20 = vsub.f32 1.5, %v1258_v11  ;;  %v1275_v50 = vmul.f32 %v1244_v31, %v2382_v21 }
 0x95c   :  { %v1688_v33 = vpop.eup %1687  ;;  %v1324_v34 = vadd.f32 %v1311_v15, %v1300_v14 }
 0x95d   :  { %v1260_v39 = vmul.f32 %v1686_v61, %v1259_v20  ;;  %v1266_v40 = vmul.f32 %v1688_v33, %v1234_v57  ;;  %vm1272_vm11 = vweird.f32 %v1688_v33  ;;  %v1299_v60 = vmul.f32 %v1282_v62, %v1275_v50 }
 0x95e   :  { %v2416_v42 = vmax.f32 %v1324_v34, 0.0  ;;  %vm1273_vm13 = vmor %vm1271_vm12, %vm1272_vm11  ;;  %v1643_v34 = vld [vmem:[%s2562_s12 + $0x20] sm:$0xff] }
 0x95f   :  { %v1264_v24 = vsel %vm1263_vm10, %v1686_v61, %v1260_v39  ;;  %v1267_v46 = vmul.f32 %v1688_v33, %v1266_v40  ;;  %v1639_v40 = vld [vmem:[%s2562_s12 + $0x10] sm:$0xff] }
 0x960   :  { %v1277_v28 = vmul.f32 %v1264_v24, %v2390_v29  ;;  %1334 = vrot.lane.b32.xlu1 %v2416_v42, %s1689_s17 }
 0x961   :  { %v1268_v41 = vmul.f32 0.5, %v1267_v46  ;;  %v1306_v63 = vpop.permute.xlu1 %1305 }
 0x962   :  { %v1301_v38 = vmul.f32 %v2377_v16, %v1277_v28 }
 0x963   :  { %v1269_v49 = vsub.f32 1.5, %v1268_v41 }
 0x964   :  { %v1325_v43 = vadd.f32 %v1316_v58, %v1301_v38 }
 0x965   :  { %v1270_v44 = vmul.f32 %v1688_v33, %v1269_v49 }
 0x966   :  { %v2422_v53 = vmax.f32 %v1325_v43, 0.0 }
 0x967   :  { %v1274_v54 = vsel %vm1273_vm13, %v1688_v33, %v1270_v44 }
 0x968   :  { %v1278_v29 = vmul.f32 %v1274_v54, %v2396_v51  ;;  %1337 = vrot.lane.b32.xlu0 %v2422_v53, %s1689_s17  ;;  %v1323_v51 = vadd.f32 %v1306_v63, %v1299_v60 }
 0x96a   :  { %v1302_v16 = vmul.f32 %v2379_v17, %v1278_v29  ;;  %v2434_v2 = vmax.f32 %v1323_v51, 0.0 }
 0x96c   :  { %v1326_v58 = vadd.f32 %v2410_v32, %v1302_v16 }
 0x96e   :  { %v2430_v22 = vmax.f32 %v1326_v58, 0.0 }
 0x970   :  { %1340 = vrot.lane.b32.xlu2 %v2430_v22, %s1689_s17 }
 0x978   :  { %1331 = vrot.lane.b32.xlu2 %v2434_v2, %s1689_s17 }
 0x9ca   :  { %v1341_v17 = vpop.permute.xlu2 %1340 }
 0x9cb   :  { %v1342_v32 = vsel %vm73_vm0, %v1341_v17, %v2430_v22 }
 0x9cc   :  { %1349 = vrot.lane.b32.xlu0 %v1342_v32, %s1689_s17 }
 0x9d2   :  { %v1332_v21 = vpop.permute.xlu2 %1331  ;;  %v1335_v1 = vpop.permute.xlu1 %1334 }
 0x9d3   :  { %v1333_v59 = vsel %vm73_vm0, %v1332_v21, %v2434_v2  ;;  %v1336_v47 = vsel %vm73_vm0, %v1335_v1, %v2416_v42 }
 0x9d4   :  { %1343 = vrot.lane.b32.xlu0 %v1333_v59, %s1689_s17  ;;  %1345 = vrot.lane.b32.xlu2 %v1336_v47, %s1689_s17 }
 0x9da   :  { %v1338_v18 = vpop.permute.xlu0 %1337 }
 0x9db   :  { %v1339_v37 = vsel %vm73_vm0, %v1338_v18, %v2422_v53 }
 0x9dc   :  { %1347 = vrot.lane.b32.xlu1 %v1339_v37, %s1689_s17  ;;  %927 = vrot.lane.b32.xlu0 %v2263_v13, %s1690_s0 }
 0x9dd   :  { %929 = vrot.lane.b32.xlu2 %v2246_v6, %s1690_s0 }
 0x9e4   :  { %931 = vrot.lane.b32.xlu1 %v2254_v9, %s1690_s0 }
 0x9ec   :  { %925 = vrot.lane.b32.xlu1 %v2259_v12, %s1690_s0 }
 0xa2e   :  { %v1346_v0 = vpop.permute.xlu2 %1345 }
 0xa2f   :  { %v1352_v52 = vsel %vm73_vm0, %v1346_v0, %v2416_v42 }
 0xa30   :  { %1361 = vrot.lane.b32.xlu1 %v1352_v52, %s1691_s22 }
 0xa37   :  { %v930_v57 = vpop.permute.xlu2 %929 }
 0xa3e   :  { %v1350_v55 = vpop.permute.xlu0 %1349 }
 0xa3f   :  { %v1354_v56 = vsel %vm73_vm0, %v1350_v55, %v2430_v22 }
 0xa40   :  { %1365 = vrot.lane.b32.xlu2 %v1354_v56, %s1691_s22 }
 0xa46   :  { %v1344_v13 = vpop.permute.xlu0 %1343 }
 0xa47   :  { %v1351_v6 = vsel %vm73_vm0, %v1344_v13, %v2434_v2 }
 0xa48   :  { %1359 = vrot.lane.b32.xlu2 %v1351_v6, %s1691_s22 }
 0xa4e   :  { %v1348_v9 = vpop.permute.xlu1 %1347  ;;  %v928_v3 = vpop.permute.xlu0 %927 }
 0xa4f   :  { %v1353_v12 = vsel %vm73_vm0, %v1348_v9, %v2422_v53  ;;  %vm1507_vm0 = vcmask 253952  }
 0xa50   :  { %1377 = vrot.lane.b32.xlu2 %v1352_v52, %s1690_s0  ;;  %1379 = vrot.lane.b32.xlu1 %v1353_v12, %s1690_s0 }
 0xa51   :  { %1363 = vrot.lane.b32.xlu0 %v1353_v12, %s1691_s22 }
 0xa56   :  { %v932_v61 = vpop.permute.xlu1 %931 }
 0xa57   :  { %1599 = vmatpush.msk.msra.mxu1 %vm67_vm1, %v932_v61 }
 0xa58   :  { %1501 = vperm.xlu2 %1660, %v1493_v30   ;;  %1496 = vperm.xlu1 %1662, %v1492_v35  }
 0xa59   :  { %1381 = vrot.lane.b32.xlu0 %v1354_v56, %s1690_s0  ;;  %1600 = vmatpush.msk.msra.mxu1 %vm67_vm1, %v930_v57 }
 0xa5b   :  { %1601 = vmatpush.msk.msra.mxu1 %vm67_vm1, %v928_v3 }
 0xa5e   :  { %v926_v5 = vpop.permute.xlu1 %925 }
 0xa5f   :  { %1602 = vmatpush.msk.msra.mxu1 %vm67_vm1, %v926_v5 }
 0xa60   :  { %1603 = vmatmul.msk.f32.vlgmr.msra.gmra.mxu1 %vm155_vm3, %v1597_v4 }
 0xa61   :  { %1375 = vrot.lane.b32.xlu0 %v1351_v6, %s1690_s0 }
 0xa68   :  { %1604 = vmatmul.msk.f32.gmra.mxu1 %vm155_vm3, %v1598_v7 }
 0xa9a   :  { %v1366_v8 = vpop.permute.xlu2 %1365 }
 0xa9b   :  { %1633 = vmatpush.msk.msrb.mxu1 %vm62_vm2, %v1366_v8 }
 0xaa2   :  { %v1360_v11 = vpop.permute.xlu2 %1359  ;;  %v1362_v14 = vpop.permute.xlu1 %1361 }
 0xaaa   :  { %v1378_v33 = vpop.permute.xlu2 %1377 }
 0xac2   :  { %v1380_v15 = vpop.permute.xlu1 %1379 }
 0xac3   :  { %v1364_v10 = vpop.permute.xlu0 %1363 }
 0xac4   :  { %1634 = vmatpush.msk.msrb.mxu1 %vm62_vm2, %v1364_v10 }
 0xac6   :  { %1635 = vmatpush.msk.msrb.mxu1 %vm62_vm2, %v1362_v14 }
 0xac8   :  { %1636 = vmatpush.msk.msrb.mxu1 %vm62_vm2, %v1360_v11 }
 0xac9   :  { %1637 = vmatmul.msk.f32.vlgmr.msrb.gmra.mxu1 %vm155_vm3, %v1391_v19 }
 0xaca   :  { %1445 = vmatpush.msra.mxu1 %v2430_v22 }
 0xacb   :  { %v1382_v20 = vpop.permute.xlu0 %1381 }
 0xacc   :  { %1446 = vmatpush.msra.mxu1 %v2422_v53  ;;  %1645 = vmatpush.msk.msrb.mxu2 %vm67_vm1, %v1382_v20  ;;  %v1497_v53 = vpop.permute.xlu1 %1496 }
 0xace   :  { %1447 = vmatpush.msra.mxu1 %v2416_v42  ;;  %1646 = vmatpush.msk.msrb.mxu2 %vm67_vm1, %v1380_v15  ;;  %v1644_v42 = vld [vmem:[%s2562_s12 + $0x28] sm:$0x1] }
 0xad0   :  { %1448 = vmatpush.msra.mxu1 %v2434_v2  ;;  %1647 = vmatpush.msk.msrb.mxu2 %vm67_vm1, %v1378_v33 }
 0xad1   :  { %1638 = vmatmul.msk.f32.gmra.mxu1 %vm155_vm3, %v1392_v25 }
 0xad3   :  { %v1376_v39 = vpop.permute.xlu0 %1375 }
 0xad4   :  { %1648 = vmatpush.msk.msrb.mxu2 %vm67_vm1, %v1376_v39 }
 0xad5   :  { %1649 = vmatmul.msk.f32.vlgmr.msrb.gmra.mxu2 %vm155_vm3, %v1643_v34 }
 0xad9   :  { %1641 = vmatmul.msk.f32.vlgmr.msra.gmra.mxu1 %vm155_vm3, %v1639_v40 }
 0xadd   :  { %1650 = vmatmul.msk.f32.gmra.mxu2 %vm155_vm3, %v1644_v42  ;;  %v1034_v23 = vpop.f32.mrf.mxu1 }
 0xade   :  { %v1040_v41 = vadd.f32 %v1034_v23, %v2360_v36  ;;  %v1502_v36 = vpop.permute.xlu2 %1501 }
 0xae1   :  { %1642 = vmatmul.msk.f32.gmra.mxu1 %vm155_vm3, %v1640_v45 }
 0xae5   :  { %v1037_v24 = vpop.f32.mrf.mxu1 }
 0xae6   :  { %v1041_v54 = vadd.f32 %v1037_v24, %v2362_v27 }
 0xb46   :  { %v1416_v46 = vpop.f32.mrf.mxu1 }
 0xb47   :  { %v1422_v38 = vadd.f32 %v1416_v46, %v1040_v41 }
 0xb4e   :  { %v1419_v28 = vpop.f32.mrf.mxu1 }
 0xb4f   :  { %v1423_v29 = vadd.f32 %v1419_v28, %v1041_v54 }
 0xb56   :  { %v1450_v48 = vpop.f32.mrf.mxu1 }
 0xb57   :  { %v1456_v49 = vadd.f32 %v1450_v48, %v1422_v38 }
 0xb58   :  { %v1484_v43 = vpop.f32.mrf.mxu2 }
 0xb59   :  { %v1490_v44 = vadd.f32 %v1484_v43, %v1456_v49 }
 0xb5b   :  { %v1504_v26 = vadd.f32 %v1497_v53, %v1490_v44 }
 0xb5d   :  { %1506 = vst.msk [vmem:[%s2563_s14] sm:$0xff] %vm155_vm3, %v1504_v26 }
 0xb5e   :  { %v1453_v16 = vpop.f32.mrf.mxu1 }
 0xb5f   :  { %v1457_v31 = vadd.f32 %v1453_v16, %v1423_v29 }
 0xb60   :  { %v1487_v58 = vpop.f32.mrf.mxu2 }
 0xb61   :  { %v1491_v62 = vadd.f32 %v1487_v58, %v1457_v31 }
 0xb63   :  { %v1505_v50 = vadd.f32 %v1502_v36, %v1491_v62 }
 0xb65   :  { %1508 = vst.msk [vmem:[%s2563_s14 + $0x8] sm:$0x1] %vm1507_vm0, %v1505_v50 }

</bundles_post_ra>
